<compile_context>
chip_gen: v7x
topology: tpu7x:2x2x1
jax: 0.10.0
libtpu: 0.0.40
codegen_flags: <defaults>
</compile_context>

<pallas_src>
import jax
import jax.numpy as jnp
from jax.experimental import pallas as pl
from jax.experimental.pallas import tpu as pltpu
import numpy as np

# ---------------- model hyper-params (small, deterministic) ----------------
HIDDEN_DIM = 32
NUM_LAYERS = 2          # kernel below is written for exactly 2 layers
NUM_VOCAB = 50
NUM_CLASSES = 4
EMBED_DIM = 16
BATCH = 2
SEQ = 8


# ---------------- weight-slab row layout (8-row aligned sections) ----------------
def _ru8(x):
    return (x + 7) & ~7


R_WIH0 = 0                                   # (2E, 8H) block-diag, gate-grouped
R_WHH0 = _ru8(R_WIH0 + 2 * EMBED_DIM)        # (2H, 8H) block-diag, gate-grouped
R_B0 = _ru8(R_WHH0 + 2 * HIDDEN_DIM)         # (1, 8H)
R_WIH1 = _ru8(R_B0 + 1)                      # (2H, 8H) [fwd ifgo | bwd ifgo]
R_B1 = _ru8(R_WIH1 + 2 * HIDDEN_DIM)         # (1, 8H)
R_WHH1 = _ru8(R_B1 + 1)                      # (H, 8H) [fwd 4H | bwd 4H]
R_WFC = _ru8(R_WHH1 + HIDDEN_DIM)            # (2H, C) in cols 0:C
R_BFC = _ru8(R_WFC + 2 * HIDDEN_DIM)         # (1, C)  in cols 0:C
SLAB_ROWS = _ru8(R_BFC + 1)
SLAB_COLS = 8 * HIDDEN_DIM


# ------------------------------ fused Pallas kernel ------------------------------
def bilstm_fused_kernel(data_ref, w_ref, out_ref, y_ref):
    """Whole forward pass in one kernel.

    data_ref : (T*B + 4*B, max(2E,2H)) f32
               rows 0:T*B          -> x_bi[t] = [x(t) | x(T-1-t)]   (cols 0:2E)
               rows T*B + 0B..1B   -> layer-0 [h_f | h_b]           (cols 0:2H)
               rows T*B + 1B..2B   -> layer-0 [c_f | c_b]
               rows T*B + 2B..3B   -> layer-1 [h_f | h_b]
               rows T*B + 3B..4B   -> layer-1 [c_f | c_b]
    w_ref    : (SLAB_ROWS, 8H) packed weight slab (see R_* layout)
    out_ref  : (B, C)
    y_ref    : (T*B, 2H) VMEM scratch for the layer-0 output sequence
    """
    B, C = out_ref.shape
    H = HIDDEN_DIM
    E = EMBED_DIM
    T = SEQ
    TB = T * B
    G4 = 4 * H
    G8 = 8 * H

    # ---- carve the weight slab (static, 8-row-aligned views; one DMA total) ----
    wih0 = w_ref[R_WIH0:R_WIH0 + 2 * E, :]            # (2E, 8H)
    whh0 = w_ref[R_WHH0:R_WHH0 + 2 * H, :]            # (2H, 8H)
    b0 = w_ref[R_B0:R_B0 + 1, :]                      # (1, 8H)
    wih1 = w_ref[R_WIH1:R_WIH1 + 2 * H, :]            # (2H, 8H)
    b1 = w_ref[R_B1:R_B1 + 1, :]                      # (1, 8H)
    whh1f = w_ref[R_WHH1:R_WHH1 + H, 0:G4]            # (H, 4H)
    whh1b = w_ref[R_WHH1:R_WHH1 + H, G4:G8]           # (H, 4H)
    wfc = w_ref[R_WFC:R_WFC + 2 * H, 0:C]             # (2H, C)
    bfc = w_ref[R_BFC:R_BFC + 1, 0:C]                 # (1, C)

    # ---- carve the per-call data slab ----
    x_bi = data_ref[0:TB, 0:2 * E]                    # (T*B, 2E)
    s = TB
    h0p = data_ref[s + 0 * B:s + 1 * B, 0:2 * H]      # (B, 2H) layer-0 [h_f|h_b]
    c0p = data_ref[s + 1 * B:s + 2 * B, 0:2 * H]
    h1p = data_ref[s + 2 * B:s + 3 * B, 0:2 * H]      # (B, 2H) layer-1 [h_f|h_b]
    c1p = data_ref[s + 3 * B:s + 4 * B, 0:2 * H]

    # ---------- layer 0: both directions fused into one recurrence matmul ----------
    # hoisted input projection, both directions in one (T*B,2E)x(2E,8H) matmul
    xg0 = jnp.dot(x_bi, wih0, preferred_element_type=jnp.float32) + b0   # (T*B, 8H)

    def step_packed(xg_t, h, c):
        # gate columns grouped [i_f i_b | f_f f_b | g_f g_b | o_f o_b] (2H each),
        # aligned with the packed state layout [fwd | bwd].
        gates = xg_t + jnp.dot(h, whh0, preferred_element_type=jnp.float32)
        sg = jax.nn.sigmoid(gates)        # one full-width EUP pass (i,f,o both dirs)
        tg = jnp.tanh(gates)              # one full-width EUP pass (g both dirs)
        i = sg[:, 0 * 2 * H:1 * 2 * H]
        f = sg[:, 1 * 2 * H:2 * 2 * H]
        g = tg[:, 2 * 2 * H:3 * 2 * H]
        o = sg[:, 3 * 2 * H:4 * 2 * H]
        c_new = f * c + i * g
        h_new = o * jnp.tanh(c_new)
        return h_new, c_new

    h, c = h0p, c0p
    for t in range(T):                    # fully unrolled (T static)
        h, c = step_packed(xg0[t * B:(t + 1) * B, :], h, c)
        tb = T - 1 - t
        # layer-0 output straight into the VMEM scratch (no concat tree, no HBM)
        y_ref[t * B:(t + 1) * B, 0:H] = h[:, 0:H]              # fwd hidden @ t
        y_ref[tb * B:(tb + 1) * B, H:2 * H] = h[:, H:2 * H]    # bwd hidden @ T-1-t

    # --------- layer 1 (last layer): only the final time step is consumed ---------
    y = y_ref[...]                                                       # (T*B, 2H)
    xg1 = jnp.dot(y, wih1, preferred_element_type=jnp.float32) + b1      # (T*B, 8H)

    def step_dir(xg_t, h, c, whh):
        gates = xg_t + jnp.dot(h, whh, preferred_element_type=jnp.float32)  # (B, 4H)
        sg = jax.nn.sigmoid(gates)
        tg = jnp.tanh(gates)
        i = sg[:, 0 * H:1 * H]
        f = sg[:, 1 * H:2 * H]
        g = tg[:, 2 * H:3 * H]
        o = sg[:, 3 * H:4 * H]
        c_new = f * c + i * g
        return o * jnp.tanh(c_new), c_new

    # reverse direction at original time T-1 == its first recurrence step
    h_b1, _ = step_dir(xg1[(T - 1) * B:T * B, G4:G8],
                       h1p[:, H:2 * H], c1p[:, H:2 * H], whh1b)
    # forward direction needs the whole chain, but only the final h
    h_f1, c_f1 = h1p[:, 0:H], c1p[:, 0:H]
    for t in range(T):
        h_f1, c_f1 = step_dir(xg1[t * B:(t + 1) * B, 0:G4], h_f1, c_f1, whh1f)

    # -------------------- head: tanh -> dropout(identity) -> fc --------------------
    h_last = jnp.tanh(jnp.concatenate([h_f1, h_b1], axis=1))             # (B, 2H)
    out_ref[...] = (jnp.dot(h_last, wfc, preferred_element_type=jnp.float32)
                    + bfc)


# ------------------------------ kernel wrapper ------------------------------
@jax.jit
def bilstm4vat_forward(w_slab, embedding, tokens, h0, c0):
    """tokens: (B, T) int32; h0, c0: (2*NUM_LAYERS, B, H) PyTorch layout."""
    B, T = tokens.shape
    H = HIDDEN_DIM
    E = EMBED_DIM

    # embedding gather in XLA (drops the table DMA + one-hot matmul prologue)
    x = embedding[tokens]                            # (B, T, E)
    x_tm = jnp.transpose(x, (1, 0, 2))               # (T, B, E) time-major
    # bidirectional input rows: [x(t) | x(T-1-t)] feeds the block-diag W_ih
    x_bi = jnp.concatenate([x_tm, x_tm[::-1]], axis=-1).reshape(T * B, 2 * E)

    def pack_state(s, l):                            # (B, 2H) = [fwd | bwd]
        return jnp.concatenate([s[2 * l], s[2 * l + 1]], axis=1)

    state = jnp.concatenate([pack_state(h0, 0), pack_state(c0, 0),
                             pack_state(h0, 1), pack_state(c0, 1)], axis=0)

    W = max(2 * E, 2 * H)
    data = jnp.zeros((T * B + 4 * B, W), jnp.float32)
    data = data.at[:T * B, :2 * E].set(x_bi)
    data = data.at[T * B:, :2 * H].set(state)

    vmem = pl.BlockSpec(memory_space=pltpu.MemorySpace.VMEM)
    return pl.pallas_call(
        bilstm_fused_kernel,
        out_shape=jax.ShapeDtypeStruct((B, NUM_CLASSES), jnp.float32),
        in_specs=[vmem, vmem],
        out_specs=vmem,
        scratch_shapes=[pltpu.VMEM((T * B, 2 * H), jnp.float32)],
    )(data, w_slab)


# ------------------------------ raw (PyTorch-layout) parameters ------------------------------
def init_raw_params(key):
    raw = {}
    k = 1.0 / np.sqrt(HIDDEN_DIM)
    key, sub = jax.random.split(key)
    raw["embedding"] = jax.random.normal(sub, (NUM_VOCAB, EMBED_DIM), jnp.float32)
    for l in range(NUM_LAYERS):
        din = EMBED_DIM if l == 0 else 2 * HIDDEN_DIM
        for suf in ("", "_rev"):
            key, k1, k2, k3, k4 = jax.random.split(key, 5)
            raw[f"wih_l{l}{suf}"] = jax.random.uniform(
                k1, (4 * HIDDEN_DIM, din), jnp.float32, -k, k)
            raw[f"whh_l{l}{suf}"] = jax.random.uniform(
                k2, (4 * HIDDEN_DIM, HIDDEN_DIM), jnp.float32, -k, k)
            raw[f"bih_l{l}{suf}"] = jax.random.uniform(
                k3, (4 * HIDDEN_DIM,), jnp.float32, -k, k)
            raw[f"bhh_l{l}{suf}"] = jax.random.uniform(
                k4, (4 * HIDDEN_DIM,), jnp.float32, -k, k)
    key, k1, k2 = jax.random.split(key, 3)
    kf = 1.0 / np.sqrt(2 * HIDDEN_DIM)
    raw["w_fc"] = jax.random.uniform(k1, (NUM_CLASSES, 2 * HIDDEN_DIM),
                                     jnp.float32, -kf, kf)
    raw["b_fc"] = jax.random.uniform(k2, (NUM_CLASSES,), jnp.float32, -kf, kf)
    return raw


# ------------------------------ weight-slab packing (done once) ------------------------------
def pack_weights(raw):
    H, E, C = HIDDEN_DIM, EMBED_DIM, NUM_CLASSES
    slab = np.zeros((SLAB_ROWS, SLAB_COLS), np.float32)

    # layer 0: block-diagonal, gate columns grouped [i_f i_b | f_f f_b | g_f g_b | o_f o_b]
    for d, suf in enumerate(("", "_rev")):
        wih = np.asarray(raw[f"wih_l0{suf}"])                 # (4H, E)
        whh = np.asarray(raw[f"whh_l0{suf}"])                 # (4H, H)
        b = np.asarray(raw[f"bih_l0{suf}"]) + np.asarray(raw[f"bhh_l0{suf}"])
        for k in range(4):
            cols = slice(2 * k * H + d * H, 2 * k * H + (d + 1) * H)
            slab[R_WIH0 + d * E:R_WIH0 + (d + 1) * E, cols] = wih[k * H:(k + 1) * H, :].T
            slab[R_WHH0 + d * H:R_WHH0 + (d + 1) * H, cols] = whh[k * H:(k + 1) * H, :].T
            slab[R_B0, cols] = b[k * H:(k + 1) * H]

    # layer 1: per-direction layout [fwd i f g o | bwd i f g o]
    for d, suf in enumerate(("", "_rev")):
        wih = np.asarray(raw[f"wih_l1{suf}"])                 # (4H, 2H)
        whh = np.asarray(raw[f"whh_l1{suf}"])                 # (4H, H)
        b = np.asarray(raw[f"bih_l1{suf}"]) + np.asarray(raw[f"bhh_l1{suf}"])
        cols = slice(d * 4 * H, (d + 1) * 4 * H)
        slab[R_WIH1:R_WIH1 + 2 * H, cols] = wih.T
        slab[R_B1, cols] = b
        slab[R_WHH1:R_WHH1 + H, cols] = whh.T

    slab[R_WFC:R_WFC + 2 * H, :C] = np.asarray(raw["w_fc"]).T
    slab[R_BFC, :C] = np.asarray(raw["b_fc"])
    return jnp.asarray(slab)


# ------------------------------ pure-JAX reference ------------------------------
def _lstm_dir_ref(x_tm, wih, whh, bih, bhh, h0, c0):
    H = h0.shape[-1]

    def step(carry, x_t):
        h, c = carry
        gates = x_t @ wih.T + h @ whh.T + bih + bhh
        i = jax.nn.sigmoid(gates[:, 0 * H:1 * H])
        f = jax.nn.sigmoid(gates[:, 1 * H:2 * H])
        g = jnp.tanh(gates[:, 2 * H:3 * H])
        o = jax.nn.sigmoid(gates[:, 3 * H:4 * H])
        c = f * c + i * g
        h = o * jnp.tanh(c)
        return (h, c), h

    _, hs = jax.lax.scan(step, (h0, c0), x_tm)
    return hs


def forward_ref(raw, tokens, h0, c0):
    x = raw["embedding"][tokens]                      # (B, T, E)
    x = jnp.transpose(x, (1, 0, 2))                   # (T, B, E)
    for l in range(NUM_LAYERS):
        fwd = _lstm_dir_ref(x, raw[f"wih_l{l}"], raw[f"whh_l{l}"],
                            raw[f"bih_l{l}"], raw[f"bhh_l{l}"],
                            h0[2 * l], c0[2 * l])
        bwd = _lstm_dir_ref(x[::-1], raw[f"wih_l{l}_rev"], raw[f"whh_l{l}_rev"],
                            raw[f"bih_l{l}_rev"], raw[f"bhh_l{l}_rev"],
                            h0[2 * l + 1], c0[2 * l + 1])[::-1]
        x = jnp.concatenate([fwd, bwd], axis=-1)
    h_t = jnp.tanh(x[-1])
    return h_t @ raw["w_fc"].T + raw["b_fc"]


# ------------------------------ main ------------------------------
if __name__ == "__main__":
    key = jax.random.PRNGKey(0)
    k_tok, k_h, k_c = jax.random.split(key, 3)
    tokens = jax.random.randint(k_tok, (BATCH, SEQ), 0, NUM_VOCAB, jnp.int32)
    h0 = jax.random.normal(k_h, (2 * NUM_LAYERS, BATCH, HIDDEN_DIM), jnp.float32)
    c0 = jax.random.normal(k_c, (2 * NUM_LAYERS, BATCH, HIDDEN_DIM), jnp.float32)

    raw = init_raw_params(jax.random.PRNGKey(42))
    w_slab = pack_weights(raw)

    out = jax.block_until_ready(
        bilstm4vat_forward(w_slab, raw["embedding"], tokens, h0, c0))
    ref = jax.block_until_ready(forward_ref(raw, tokens, h0, c0))

    np.testing.assert_allclose(np.asarray(out), np.asarray(ref),
                               rtol=1e-3, atol=1e-3)
    assert out.shape == (BATCH, NUM_CLASSES)
    print("KERNEL_OK")
</pallas_src>

<mosaic_0001>
module attributes {stable_mosaic.version = 11 : i64} {
  func.func @bilstm_fused_kernel(%arg0: memref<24x64xf32, #tpu.memory_space<vmem>>, %arg1: memref<280x256xf32, #tpu.memory_space<vmem>>, %arg2: memref<2x4xf32, #tpu.memory_space<vmem>>, %arg3: memref<16x64xf32, #tpu.memory_space<vmem>>) attributes {dimension_semantics = [], scalar_prefetch = 0 : i64, scratch_operands = 1 : i64, tpu.core_type = #tpu.core_type<tc>} {
    %c0 = arith.constant 0 : index
    %c0_0 = arith.constant 0 : index
    %0 = vector.load %arg1[%c0, %c0_0] : memref<280x256xf32, #tpu.memory_space<vmem>>, vector<32x256xf32>
    %c32 = arith.constant 32 : index
    %c0_1 = arith.constant 0 : index
    %1 = vector.load %arg1[%c32, %c0_1] : memref<280x256xf32, #tpu.memory_space<vmem>>, vector<64x256xf32>
    %c96 = arith.constant 96 : index
    %c0_2 = arith.constant 0 : index
    %2 = vector.load %arg1[%c96, %c0_2] : memref<280x256xf32, #tpu.memory_space<vmem>>, vector<1x256xf32>
    %c104 = arith.constant 104 : index
    %c0_3 = arith.constant 0 : index
    %3 = vector.load %arg1[%c104, %c0_3] : memref<280x256xf32, #tpu.memory_space<vmem>>, vector<64x256xf32>
    %c168 = arith.constant 168 : index
    %c0_4 = arith.constant 0 : index
    %4 = vector.load %arg1[%c168, %c0_4] : memref<280x256xf32, #tpu.memory_space<vmem>>, vector<1x256xf32>
    %c176 = arith.constant 176 : index
    %c0_5 = arith.constant 0 : index
    %5 = vector.load %arg1[%c176, %c0_5] : memref<280x256xf32, #tpu.memory_space<vmem>>, vector<32x128xf32>
    %c176_6 = arith.constant 176 : index
    %c128 = arith.constant 128 : index
    %6 = vector.load %arg1[%c176_6, %c128] : memref<280x256xf32, #tpu.memory_space<vmem>>, vector<32x128xf32>
    %c208 = arith.constant 208 : index
    %c0_7 = arith.constant 0 : index
    %7 = vector.load %arg1[%c208, %c0_7] : memref<280x256xf32, #tpu.memory_space<vmem>>, vector<64x4xf32>
    %c272 = arith.constant 272 : index
    %c0_8 = arith.constant 0 : index
    %8 = vector.load %arg1[%c272, %c0_8] : memref<280x256xf32, #tpu.memory_space<vmem>>, vector<1x4xf32>
    %c0_9 = arith.constant 0 : index
    %c0_10 = arith.constant 0 : index
    %9 = vector.load %arg0[%c0_9, %c0_10] : memref<24x64xf32, #tpu.memory_space<vmem>>, vector<16x32xf32>
    %c16 = arith.constant 16 : index
    %c0_11 = arith.constant 0 : index
    %10 = vector.load %arg0[%c16, %c0_11] : memref<24x64xf32, #tpu.memory_space<vmem>>, vector<2x64xf32>
    %c18 = arith.constant 18 : index
    %c0_12 = arith.constant 0 : index
    %11 = vector.load %arg0[%c18, %c0_12] : memref<24x64xf32, #tpu.memory_space<vmem>>, vector<2x64xf32>
    %c20 = arith.constant 20 : index
    %c0_13 = arith.constant 0 : index
    %12 = vector.load %arg0[%c20, %c0_13] : memref<24x64xf32, #tpu.memory_space<vmem>>, vector<2x64xf32>
    %c22 = arith.constant 22 : index
    %c0_14 = arith.constant 0 : index
    %13 = vector.load %arg0[%c22, %c0_14] : memref<24x64xf32, #tpu.memory_space<vmem>>, vector<2x64xf32>
    %cst = arith.constant dense<0.000000e+00> : vector<16x256xf32>
    %14 = tpu.matmul %9, %0, %cst {dimension_numbers = #tpu.dot_dimension_numbers<[1], [0], [0], [1], [0, 0, 1, 1], [], []>} : vector<16x32xf32>, vector<32x256xf32>, vector<16x256xf32> -> vector<16x256xf32>
    %15 = vector.broadcast %2 : vector<1x256xf32> to vector<16x256xf32>
    %16 = arith.addf %14, %15 : vector<16x256xf32>
    %17 = vector.extract_strided_slice %16 {offsets = [0, 0], sizes = [2, 256], strides = [1, 1]} : vector<16x256xf32> to vector<2x256xf32>
    %cst_15 = arith.constant dense<0.000000e+00> : vector<2x256xf32>
    %18 = tpu.matmul %10, %1, %cst_15 {dimension_numbers = #tpu.dot_dimension_numbers<[1], [0], [0], [1], [0, 0, 1, 1], [], []>} : vector<2x64xf32>, vector<64x256xf32>, vector<2x256xf32> -> vector<2x256xf32>
    %19 = arith.addf %17, %18 : vector<2x256xf32>
    %20 = arith.negf %19 : vector<2x256xf32>
    %21 = math.exp %20 : vector<2x256xf32>
    %cst_16 = arith.constant 1.000000e+00 : f32
    %22 = vector.broadcast %cst_16 : f32 to vector<2x256xf32>
    %23 = arith.addf %22, %21 : vector<2x256xf32>
    %24 = arith.divf %22, %23 : vector<2x256xf32>
    %25 = math.tanh %19 : vector<2x256xf32>
    %26 = vector.extract_strided_slice %24 {offsets = [0, 0], sizes = [2, 64], strides = [1, 1]} : vector<2x256xf32> to vector<2x64xf32>
    %27 = vector.extract_strided_slice %24 {offsets = [0, 64], sizes = [2, 64], strides = [1, 1]} : vector<2x256xf32> to vector<2x64xf32>
    %28 = vector.extract_strided_slice %25 {offsets = [0, 128], sizes = [2, 64], strides = [1, 1]} : vector<2x256xf32> to vector<2x64xf32>
    %29 = vector.extract_strided_slice %24 {offsets = [0, 192], sizes = [2, 64], strides = [1, 1]} : vector<2x256xf32> to vector<2x64xf32>
    %30 = arith.mulf %27, %11 : vector<2x64xf32>
    %31 = arith.mulf %26, %28 : vector<2x64xf32>
    %32 = arith.addf %30, %31 : vector<2x64xf32>
    %33 = math.tanh %32 : vector<2x64xf32>
    %34 = arith.mulf %29, %33 : vector<2x64xf32>
    %35 = vector.extract_strided_slice %34 {offsets = [0, 0], sizes = [2, 32], strides = [1, 1]} : vector<2x64xf32> to vector<2x32xf32>
    %c0_17 = arith.constant 0 : index
    %c0_18 = arith.constant 0 : index
    %36 = vector.load %arg3[%c0_17, %c0_18] : memref<16x64xf32, #tpu.memory_space<vmem>>, vector<2x32xf32>
    tpu.vector_store %arg3[%c0_17, %c0_18], %35 {strides = array<i32>} : memref<16x64xf32, #tpu.memory_space<vmem>>, vector<2x32xf32>,
    %37 = vector.extract_strided_slice %34 {offsets = [0, 32], sizes = [2, 32], strides = [1, 1]} : vector<2x64xf32> to vector<2x32xf32>
    %c14 = arith.constant 14 : index
    %c32_19 = arith.constant 32 : index
    %38 = vector.load %arg3[%c14, %c32_19] : memref<16x64xf32, #tpu.memory_space<vmem>>, vector<2x32xf32>
    tpu.vector_store %arg3[%c14, %c32_19], %37 {strides = array<i32>} : memref<16x64xf32, #tpu.memory_space<vmem>>, vector<2x32xf32>,
    %39 = vector.extract_strided_slice %16 {offsets = [2, 0], sizes = [2, 256], strides = [1, 1]} : vector<16x256xf32> to vector<2x256xf32>
    %cst_20 = arith.constant dense<0.000000e+00> : vector<2x256xf32>
    %40 = tpu.matmul %34, %1, %cst_20 {dimension_numbers = #tpu.dot_dimension_numbers<[1], [0], [0], [1], [0, 0, 1, 1], [], []>} : vector<2x64xf32>, vector<64x256xf32>, vector<2x256xf32> -> vector<2x256xf32>
    %41 = arith.addf %39, %40 : vector<2x256xf32>
    %42 = arith.negf %41 : vector<2x256xf32>
    %43 = math.exp %42 : vector<2x256xf32>
    %cst_21 = arith.constant 1.000000e+00 : f32
    %44 = vector.broadcast %cst_21 : f32 to vector<2x256xf32>
    %45 = arith.addf %44, %43 : vector<2x256xf32>
    %46 = arith.divf %44, %45 : vector<2x256xf32>
    %47 = math.tanh %41 : vector<2x256xf32>
    %48 = vector.extract_strided_slice %46 {offsets = [0, 0], sizes = [2, 64], strides = [1, 1]} : vector<2x256xf32> to vector<2x64xf32>
    %49 = vector.extract_strided_slice %46 {offsets = [0, 64], sizes = [2, 64], strides = [1, 1]} : vector<2x256xf32> to vector<2x64xf32>
    %50 = vector.extract_strided_slice %47 {offsets = [0, 128], sizes = [2, 64], strides = [1, 1]} : vector<2x256xf32> to vector<2x64xf32>
    %51 = vector.extract_strided_slice %46 {offsets = [0, 192], sizes = [2, 64], strides = [1, 1]} : vector<2x256xf32> to vector<2x64xf32>
    %52 = arith.mulf %49, %32 : vector<2x64xf32>
    %53 = arith.mulf %48, %50 : vector<2x64xf32>
    %54 = arith.addf %52, %53 : vector<2x64xf32>
    %55 = math.tanh %54 : vector<2x64xf32>
    %56 = arith.mulf %51, %55 : vector<2x64xf32>
    %57 = vector.extract_strided_slice %56 {offsets = [0, 0], sizes = [2, 32], strides = [1, 1]} : vector<2x64xf32> to vector<2x32xf32>
    %c2 = arith.constant 2 : index
    %c0_22 = arith.constant 0 : index
    %58 = vector.load %arg3[%c2, %c0_22] : memref<16x64xf32, #tpu.memory_space<vmem>>, vector<2x32xf32>
    tpu.vector_store %arg3[%c2, %c0_22], %57 {strides = array<i32>} : memref<16x64xf32, #tpu.memory_space<vmem>>, vector<2x32xf32>,
    %59 = vector.extract_strided_slice %56 {offsets = [0, 32], sizes = [2, 32], strides = [1, 1]} : vector<2x64xf32> to vector<2x32xf32>
    %c12 = arith.constant 12 : index
    %c32_23 = arith.constant 32 : index
    %60 = vector.load %arg3[%c12, %c32_23] : memref<16x64xf32, #tpu.memory_space<vmem>>, vector<2x32xf32>
    tpu.vector_store %arg3[%c12, %c32_23], %59 {strides = array<i32>} : memref<16x64xf32, #tpu.memory_space<vmem>>, vector<2x32xf32>,
    %61 = vector.extract_strided_slice %16 {offsets = [4, 0], sizes = [2, 256], strides = [1, 1]} : vector<16x256xf32> to vector<2x256xf32>
    %cst_24 = arith.constant dense<0.000000e+00> : vector<2x256xf32>
    %62 = tpu.matmul %56, %1, %cst_24 {dimension_numbers = #tpu.dot_dimension_numbers<[1], [0], [0], [1], [0, 0, 1, 1], [], []>} : vector<2x64xf32>, vector<64x256xf32>, vector<2x256xf32> -> vector<2x256xf32>
    %63 = arith.addf %61, %62 : vector<2x256xf32>
    %64 = arith.negf %63 : vector<2x256xf32>
    %65 = math.exp %64 : vector<2x256xf32>
    %cst_25 = arith.constant 1.000000e+00 : f32
    %66 = vector.broadcast %cst_25 : f32 to vector<2x256xf32>
    %67 = arith.addf %66, %65 : vector<2x256xf32>
    %68 = arith.divf %66, %67 : vector<2x256xf32>
    %69 = math.tanh %63 : vector<2x256xf32>
    %70 = vector.extract_strided_slice %68 {offsets = [0, 0], sizes = [2, 64], strides = [1, 1]} : vector<2x256xf32> to vector<2x64xf32>
    %71 = vector.extract_strided_slice %68 {offsets = [0, 64], sizes = [2, 64], strides = [1, 1]} : vector<2x256xf32> to vector<2x64xf32>
    %72 = vector.extract_strided_slice %69 {offsets = [0, 128], sizes = [2, 64], strides = [1, 1]} : vector<2x256xf32> to vector<2x64xf32>
    %73 = vector.extract_strided_slice %68 {offsets = [0, 192], sizes = [2, 64], strides = [1, 1]} : vector<2x256xf32> to vector<2x64xf32>
    %74 = arith.mulf %71, %54 : vector<2x64xf32>
    %75 = arith.mulf %70, %72 : vector<2x64xf32>
    %76 = arith.addf %74, %75 : vector<2x64xf32>
    %77 = math.tanh %76 : vector<2x64xf32>
    %78 = arith.mulf %73, %77 : vector<2x64xf32>
    %79 = vector.extract_strided_slice %78 {offsets = [0, 0], sizes = [2, 32], strides = [1, 1]} : vector<2x64xf32> to vector<2x32xf32>
    %c4 = arith.constant 4 : index
    %c0_26 = arith.constant 0 : index
    %80 = vector.load %arg3[%c4, %c0_26] : memref<16x64xf32, #tpu.memory_space<vmem>>, vector<2x32xf32>
    tpu.vector_store %arg3[%c4, %c0_26], %79 {strides = array<i32>} : memref<16x64xf32, #tpu.memory_space<vmem>>, vector<2x32xf32>,
    %81 = vector.extract_strided_slice %78 {offsets = [0, 32], sizes = [2, 32], strides = [1, 1]} : vector<2x64xf32> to vector<2x32xf32>
    %c10 = arith.constant 10 : index
    %c32_27 = arith.constant 32 : index
    %82 = vector.load %arg3[%c10, %c32_27] : memref<16x64xf32, #tpu.memory_space<vmem>>, vector<2x32xf32>
    tpu.vector_store %arg3[%c10, %c32_27], %81 {strides = array<i32>} : memref<16x64xf32, #tpu.memory_space<vmem>>, vector<2x32xf32>,
    %83 = vector.extract_strided_slice %16 {offsets = [6, 0], sizes = [2, 256], strides = [1, 1]} : vector<16x256xf32> to vector<2x256xf32>
    %cst_28 = arith.constant dense<0.000000e+00> : vector<2x256xf32>
    %84 = tpu.matmul %78, %1, %cst_28 {dimension_numbers = #tpu.dot_dimension_numbers<[1], [0], [0], [1], [0, 0, 1, 1], [], []>} : vector<2x64xf32>, vector<64x256xf32>, vector<2x256xf32> -> vector<2x256xf32>
    %85 = arith.addf %83, %84 : vector<2x256xf32>
    %86 = arith.negf %85 : vector<2x256xf32>
    %87 = math.exp %86 : vector<2x256xf32>
    %cst_29 = arith.constant 1.000000e+00 : f32
    %88 = vector.broadcast %cst_29 : f32 to vector<2x256xf32>
    %89 = arith.addf %88, %87 : vector<2x256xf32>
    %90 = arith.divf %88, %89 : vector<2x256xf32>
    %91 = math.tanh %85 : vector<2x256xf32>
    %92 = vector.extract_strided_slice %90 {offsets = [0, 0], sizes = [2, 64], strides = [1, 1]} : vector<2x256xf32> to vector<2x64xf32>
    %93 = vector.extract_strided_slice %90 {offsets = [0, 64], sizes = [2, 64], strides = [1, 1]} : vector<2x256xf32> to vector<2x64xf32>
    %94 = vector.extract_strided_slice %91 {offsets = [0, 128], sizes = [2, 64], strides = [1, 1]} : vector<2x256xf32> to vector<2x64xf32>
    %95 = vector.extract_strided_slice %90 {offsets = [0, 192], sizes = [2, 64], strides = [1, 1]} : vector<2x256xf32> to vector<2x64xf32>
    %96 = arith.mulf %93, %76 : vector<2x64xf32>
    %97 = arith.mulf %92, %94 : vector<2x64xf32>
    %98 = arith.addf %96, %97 : vector<2x64xf32>
    %99 = math.tanh %98 : vector<2x64xf32>
    %100 = arith.mulf %95, %99 : vector<2x64xf32>
    %101 = vector.extract_strided_slice %100 {offsets = [0, 0], sizes = [2, 32], strides = [1, 1]} : vector<2x64xf32> to vector<2x32xf32>
    %c6 = arith.constant 6 : index
    %c0_30 = arith.constant 0 : index
    %102 = vector.load %arg3[%c6, %c0_30] : memref<16x64xf32, #tpu.memory_space<vmem>>, vector<2x32xf32>
    tpu.vector_store %arg3[%c6, %c0_30], %101 {strides = array<i32>} : memref<16x64xf32, #tpu.memory_space<vmem>>, vector<2x32xf32>,
    %103 = vector.extract_strided_slice %100 {offsets = [0, 32], sizes = [2, 32], strides = [1, 1]} : vector<2x64xf32> to vector<2x32xf32>
    %c8 = arith.constant 8 : index
    %c32_31 = arith.constant 32 : index
    %104 = vector.load %arg3[%c8, %c32_31] : memref<16x64xf32, #tpu.memory_space<vmem>>, vector<2x32xf32>
    tpu.vector_store %arg3[%c8, %c32_31], %103 {strides = array<i32>} : memref<16x64xf32, #tpu.memory_space<vmem>>, vector<2x32xf32>,
    %105 = vector.extract_strided_slice %16 {offsets = [8, 0], sizes = [2, 256], strides = [1, 1]} : vector<16x256xf32> to vector<2x256xf32>
    %cst_32 = arith.constant dense<0.000000e+00> : vector<2x256xf32>
    %106 = tpu.matmul %100, %1, %cst_32 {dimension_numbers = #tpu.dot_dimension_numbers<[1], [0], [0], [1], [0, 0, 1, 1], [], []>} : vector<2x64xf32>, vector<64x256xf32>, vector<2x256xf32> -> vector<2x256xf32>
    %107 = arith.addf %105, %106 : vector<2x256xf32>
    %108 = arith.negf %107 : vector<2x256xf32>
    %109 = math.exp %108 : vector<2x256xf32>
    %cst_33 = arith.constant 1.000000e+00 : f32
    %110 = vector.broadcast %cst_33 : f32 to vector<2x256xf32>
    %111 = arith.addf %110, %109 : vector<2x256xf32>
    %112 = arith.divf %110, %111 : vector<2x256xf32>
    %113 = math.tanh %107 : vector<2x256xf32>
    %114 = vector.extract_strided_slice %112 {offsets = [0, 0], sizes = [2, 64], strides = [1, 1]} : vector<2x256xf32> to vector<2x64xf32>
    %115 = vector.extract_strided_slice %112 {offsets = [0, 64], sizes = [2, 64], strides = [1, 1]} : vector<2x256xf32> to vector<2x64xf32>
    %116 = vector.extract_strided_slice %113 {offsets = [0, 128], sizes = [2, 64], strides = [1, 1]} : vector<2x256xf32> to vector<2x64xf32>
    %117 = vector.extract_strided_slice %112 {offsets = [0, 192], sizes = [2, 64], strides = [1, 1]} : vector<2x256xf32> to vector<2x64xf32>
    %118 = arith.mulf %115, %98 : vector<2x64xf32>
    %119 = arith.mulf %114, %116 : vector<2x64xf32>
    %120 = arith.addf %118, %119 : vector<2x64xf32>
    %121 = math.tanh %120 : vector<2x64xf32>
    %122 = arith.mulf %117, %121 : vector<2x64xf32>
    %123 = vector.extract_strided_slice %122 {offsets = [0, 0], sizes = [2, 32], strides = [1, 1]} : vector<2x64xf32> to vector<2x32xf32>
    %c8_34 = arith.constant 8 : index
    %c0_35 = arith.constant 0 : index
    %124 = vector.load %arg3[%c8_34, %c0_35] : memref<16x64xf32, #tpu.memory_space<vmem>>, vector<2x32xf32>
    tpu.vector_store %arg3[%c8_34, %c0_35], %123 {strides = array<i32>} : memref<16x64xf32, #tpu.memory_space<vmem>>, vector<2x32xf32>,
    %125 = vector.extract_strided_slice %122 {offsets = [0, 32], sizes = [2, 32], strides = [1, 1]} : vector<2x64xf32> to vector<2x32xf32>
    %c6_36 = arith.constant 6 : index
    %c32_37 = arith.constant 32 : index
    %126 = vector.load %arg3[%c6_36, %c32_37] : memref<16x64xf32, #tpu.memory_space<vmem>>, vector<2x32xf32>
    tpu.vector_store %arg3[%c6_36, %c32_37], %125 {strides = array<i32>} : memref<16x64xf32, #tpu.memory_space<vmem>>, vector<2x32xf32>,
    %127 = vector.extract_strided_slice %16 {offsets = [10, 0], sizes = [2, 256], strides = [1, 1]} : vector<16x256xf32> to vector<2x256xf32>
    %cst_38 = arith.constant dense<0.000000e+00> : vector<2x256xf32>
    %128 = tpu.matmul %122, %1, %cst_38 {dimension_numbers = #tpu.dot_dimension_numbers<[1], [0], [0], [1], [0, 0, 1, 1], [], []>} : vector<2x64xf32>, vector<64x256xf32>, vector<2x256xf32> -> vector<2x256xf32>
    %129 = arith.addf %127, %128 : vector<2x256xf32>
    %130 = arith.negf %129 : vector<2x256xf32>
    %131 = math.exp %130 : vector<2x256xf32>
    %cst_39 = arith.constant 1.000000e+00 : f32
    %132 = vector.broadcast %cst_39 : f32 to vector<2x256xf32>
    %133 = arith.addf %132, %131 : vector<2x256xf32>
    %134 = arith.divf %132, %133 : vector<2x256xf32>
    %135 = math.tanh %129 : vector<2x256xf32>
    %136 = vector.extract_strided_slice %134 {offsets = [0, 0], sizes = [2, 64], strides = [1, 1]} : vector<2x256xf32> to vector<2x64xf32>
    %137 = vector.extract_strided_slice %134 {offsets = [0, 64], sizes = [2, 64], strides = [1, 1]} : vector<2x256xf32> to vector<2x64xf32>
    %138 = vector.extract_strided_slice %135 {offsets = [0, 128], sizes = [2, 64], strides = [1, 1]} : vector<2x256xf32> to vector<2x64xf32>
    %139 = vector.extract_strided_slice %134 {offsets = [0, 192], sizes = [2, 64], strides = [1, 1]} : vector<2x256xf32> to vector<2x64xf32>
    %140 = arith.mulf %137, %120 : vector<2x64xf32>
    %141 = arith.mulf %136, %138 : vector<2x64xf32>
    %142 = arith.addf %140, %141 : vector<2x64xf32>
    %143 = math.tanh %142 : vector<2x64xf32>
    %144 = arith.mulf %139, %143 : vector<2x64xf32>
    %145 = vector.extract_strided_slice %144 {offsets = [0, 0], sizes = [2, 32], strides = [1, 1]} : vector<2x64xf32> to vector<2x32xf32>
    %c10_40 = arith.constant 10 : index
    %c0_41 = arith.constant 0 : index
    %146 = vector.load %arg3[%c10_40, %c0_41] : memref<16x64xf32, #tpu.memory_space<vmem>>, vector<2x32xf32>
    tpu.vector_store %arg3[%c10_40, %c0_41], %145 {strides = array<i32>} : memref<16x64xf32, #tpu.memory_space<vmem>>, vector<2x32xf32>,
    %147 = vector.extract_strided_slice %144 {offsets = [0, 32], sizes = [2, 32], strides = [1, 1]} : vector<2x64xf32> to vector<2x32xf32>
    %c4_42 = arith.constant 4 : index
    %c32_43 = arith.constant 32 : index
    %148 = vector.load %arg3[%c4_42, %c32_43] : memref<16x64xf32, #tpu.memory_space<vmem>>, vector<2x32xf32>
    tpu.vector_store %arg3[%c4_42, %c32_43], %147 {strides = array<i32>} : memref<16x64xf32, #tpu.memory_space<vmem>>, vector<2x32xf32>,
    %149 = vector.extract_strided_slice %16 {offsets = [12, 0], sizes = [2, 256], strides = [1, 1]} : vector<16x256xf32> to vector<2x256xf32>
    %cst_44 = arith.constant dense<0.000000e+00> : vector<2x256xf32>
    %150 = tpu.matmul %144, %1, %cst_44 {dimension_numbers = #tpu.dot_dimension_numbers<[1], [0], [0], [1], [0, 0, 1, 1], [], []>} : vector<2x64xf32>, vector<64x256xf32>, vector<2x256xf32> -> vector<2x256xf32>
    %151 = arith.addf %149, %150 : vector<2x256xf32>
    %152 = arith.negf %151 : vector<2x256xf32>
    %153 = math.exp %152 : vector<2x256xf32>
    %cst_45 = arith.constant 1.000000e+00 : f32
    %154 = vector.broadcast %cst_45 : f32 to vector<2x256xf32>
    %155 = arith.addf %154, %153 : vector<2x256xf32>
    %156 = arith.divf %154, %155 : vector<2x256xf32>
    %157 = math.tanh %151 : vector<2x256xf32>
    %158 = vector.extract_strided_slice %156 {offsets = [0, 0], sizes = [2, 64], strides = [1, 1]} : vector<2x256xf32> to vector<2x64xf32>
    %159 = vector.extract_strided_slice %156 {offsets = [0, 64], sizes = [2, 64], strides = [1, 1]} : vector<2x256xf32> to vector<2x64xf32>
    %160 = vector.extract_strided_slice %157 {offsets = [0, 128], sizes = [2, 64], strides = [1, 1]} : vector<2x256xf32> to vector<2x64xf32>
    %161 = vector.extract_strided_slice %156 {offsets = [0, 192], sizes = [2, 64], strides = [1, 1]} : vector<2x256xf32> to vector<2x64xf32>
    %162 = arith.mulf %159, %142 : vector<2x64xf32>
    %163 = arith.mulf %158, %160 : vector<2x64xf32>
    %164 = arith.addf %162, %163 : vector<2x64xf32>
    %165 = math.tanh %164 : vector<2x64xf32>
    %166 = arith.mulf %161, %165 : vector<2x64xf32>
    %167 = vector.extract_strided_slice %166 {offsets = [0, 0], sizes = [2, 32], strides = [1, 1]} : vector<2x64xf32> to vector<2x32xf32>
    %c12_46 = arith.constant 12 : index
    %c0_47 = arith.constant 0 : index
    %168 = vector.load %arg3[%c12_46, %c0_47] : memref<16x64xf32, #tpu.memory_space<vmem>>, vector<2x32xf32>
    tpu.vector_store %arg3[%c12_46, %c0_47], %167 {strides = array<i32>} : memref<16x64xf32, #tpu.memory_space<vmem>>, vector<2x32xf32>,
    %169 = vector.extract_strided_slice %166 {offsets = [0, 32], sizes = [2, 32], strides = [1, 1]} : vector<2x64xf32> to vector<2x32xf32>
    %c2_48 = arith.constant 2 : index
    %c32_49 = arith.constant 32 : index
    %170 = vector.load %arg3[%c2_48, %c32_49] : memref<16x64xf32, #tpu.memory_space<vmem>>, vector<2x32xf32>
    tpu.vector_store %arg3[%c2_48, %c32_49], %169 {strides = array<i32>} : memref<16x64xf32, #tpu.memory_space<vmem>>, vector<2x32xf32>,
    %171 = vector.extract_strided_slice %16 {offsets = [14, 0], sizes = [2, 256], strides = [1, 1]} : vector<16x256xf32> to vector<2x256xf32>
    %cst_50 = arith.constant dense<0.000000e+00> : vector<2x256xf32>
    %172 = tpu.matmul %166, %1, %cst_50 {dimension_numbers = #tpu.dot_dimension_numbers<[1], [0], [0], [1], [0, 0, 1, 1], [], []>} : vector<2x64xf32>, vector<64x256xf32>, vector<2x256xf32> -> vector<2x256xf32>
    %173 = arith.addf %171, %172 : vector<2x256xf32>
    %174 = arith.negf %173 : vector<2x256xf32>
    %175 = math.exp %174 : vector<2x256xf32>
    %cst_51 = arith.constant 1.000000e+00 : f32
    %176 = vector.broadcast %cst_51 : f32 to vector<2x256xf32>
    %177 = arith.addf %176, %175 : vector<2x256xf32>
    %178 = arith.divf %176, %177 : vector<2x256xf32>
    %179 = math.tanh %173 : vector<2x256xf32>
    %180 = vector.extract_strided_slice %178 {offsets = [0, 0], sizes = [2, 64], strides = [1, 1]} : vector<2x256xf32> to vector<2x64xf32>
    %181 = vector.extract_strided_slice %178 {offsets = [0, 64], sizes = [2, 64], strides = [1, 1]} : vector<2x256xf32> to vector<2x64xf32>
    %182 = vector.extract_strided_slice %179 {offsets = [0, 128], sizes = [2, 64], strides = [1, 1]} : vector<2x256xf32> to vector<2x64xf32>
    %183 = vector.extract_strided_slice %178 {offsets = [0, 192], sizes = [2, 64], strides = [1, 1]} : vector<2x256xf32> to vector<2x64xf32>
    %184 = arith.mulf %181, %164 : vector<2x64xf32>
    %185 = arith.mulf %180, %182 : vector<2x64xf32>
    %186 = arith.addf %184, %185 : vector<2x64xf32>
    %187 = math.tanh %186 : vector<2x64xf32>
    %188 = arith.mulf %183, %187 : vector<2x64xf32>
    %189 = vector.extract_strided_slice %188 {offsets = [0, 0], sizes = [2, 32], strides = [1, 1]} : vector<2x64xf32> to vector<2x32xf32>
    %c14_52 = arith.constant 14 : index
    %c0_53 = arith.constant 0 : index
    %190 = vector.load %arg3[%c14_52, %c0_53] : memref<16x64xf32, #tpu.memory_space<vmem>>, vector<2x32xf32>
    tpu.vector_store %arg3[%c14_52, %c0_53], %189 {strides = array<i32>} : memref<16x64xf32, #tpu.memory_space<vmem>>, vector<2x32xf32>,
    %191 = vector.extract_strided_slice %188 {offsets = [0, 32], sizes = [2, 32], strides = [1, 1]} : vector<2x64xf32> to vector<2x32xf32>
    %c0_54 = arith.constant 0 : index
    %c32_55 = arith.constant 32 : index
    %192 = vector.load %arg3[%c0_54, %c32_55] : memref<16x64xf32, #tpu.memory_space<vmem>>, vector<2x32xf32>
    tpu.vector_store %arg3[%c0_54, %c32_55], %191 {strides = array<i32>} : memref<16x64xf32, #tpu.memory_space<vmem>>, vector<2x32xf32>,
    %c0_56 = arith.constant 0 : index
    %c0_57 = arith.constant 0 : index
    %193 = vector.load %arg3[%c0_56, %c0_57] : memref<16x64xf32, #tpu.memory_space<vmem>>, vector<16x64xf32>
    %cst_58 = arith.constant dense<0.000000e+00> : vector<16x256xf32>
    %194 = tpu.matmul %193, %3, %cst_58 {dimension_numbers = #tpu.dot_dimension_numbers<[1], [0], [0], [1], [0, 0, 1, 1], [], []>} : vector<16x64xf32>, vector<64x256xf32>, vector<16x256xf32> -> vector<16x256xf32>
    %195 = vector.broadcast %4 : vector<1x256xf32> to vector<16x256xf32>
    %196 = arith.addf %194, %195 : vector<16x256xf32>
    %197 = vector.extract_strided_slice %196 {offsets = [14, 128], sizes = [2, 128], strides = [1, 1]} : vector<16x256xf32> to vector<2x128xf32>
    %198 = vector.extract_strided_slice %12 {offsets = [0, 32], sizes = [2, 32], strides = [1, 1]} : vector<2x64xf32> to vector<2x32xf32>
    %199 = vector.extract_strided_slice %13 {offsets = [0, 32], sizes = [2, 32], strides = [1, 1]} : vector<2x64xf32> to vector<2x32xf32>
    %cst_59 = arith.constant dense<0.000000e+00> : vector<2x128xf32>
    %200 = tpu.matmul %198, %6, %cst_59 {dimension_numbers = #tpu.dot_dimension_numbers<[1], [0], [0], [1], [0, 0, 1, 1], [], []>} : vector<2x32xf32>, vector<32x128xf32>, vector<2x128xf32> -> vector<2x128xf32>
    %201 = arith.addf %197, %200 : vector<2x128xf32>
    %202 = arith.negf %201 : vector<2x128xf32>
    %203 = math.exp %202 : vector<2x128xf32>
    %cst_60 = arith.constant 1.000000e+00 : f32
    %204 = vector.broadcast %cst_60 : f32 to vector<2x128xf32>
    %205 = arith.addf %204, %203 : vector<2x128xf32>
    %206 = arith.divf %204, %205 : vector<2x128xf32>
    %207 = math.tanh %201 : vector<2x128xf32>
    %208 = vector.extract_strided_slice %206 {offsets = [0, 0], sizes = [2, 32], strides = [1, 1]} : vector<2x128xf32> to vector<2x32xf32>
    %209 = vector.extract_strided_slice %206 {offsets = [0, 32], sizes = [2, 32], strides = [1, 1]} : vector<2x128xf32> to vector<2x32xf32>
    %210 = vector.extract_strided_slice %207 {offsets = [0, 64], sizes = [2, 32], strides = [1, 1]} : vector<2x128xf32> to vector<2x32xf32>
    %211 = vector.extract_strided_slice %206 {offsets = [0, 96], sizes = [2, 32], strides = [1, 1]} : vector<2x128xf32> to vector<2x32xf32>
    %212 = arith.mulf %209, %199 : vector<2x32xf32>
    %213 = arith.mulf %208, %210 : vector<2x32xf32>
    %214 = arith.addf %212, %213 : vector<2x32xf32>
    %215 = math.tanh %214 : vector<2x32xf32>
    %216 = arith.mulf %211, %215 : vector<2x32xf32>
    %217 = vector.extract_strided_slice %12 {offsets = [0, 0], sizes = [2, 32], strides = [1, 1]} : vector<2x64xf32> to vector<2x32xf32>
    %218 = vector.extract_strided_slice %13 {offsets = [0, 0], sizes = [2, 32], strides = [1, 1]} : vector<2x64xf32> to vector<2x32xf32>
    %219 = vector.extract_strided_slice %196 {offsets = [0, 0], sizes = [2, 128], strides = [1, 1]} : vector<16x256xf32> to vector<2x128xf32>
    %cst_61 = arith.constant dense<0.000000e+00> : vector<2x128xf32>
    %220 = tpu.matmul %217, %5, %cst_61 {dimension_numbers = #tpu.dot_dimension_numbers<[1], [0], [0], [1], [0, 0, 1, 1], [], []>} : vector<2x32xf32>, vector<32x128xf32>, vector<2x128xf32> -> vector<2x128xf32>
    %221 = arith.addf %219, %220 : vector<2x128xf32>
    %222 = arith.negf %221 : vector<2x128xf32>
    %223 = math.exp %222 : vector<2x128xf32>
    %cst_62 = arith.constant 1.000000e+00 : f32
    %224 = vector.broadcast %cst_62 : f32 to vector<2x128xf32>
    %225 = arith.addf %224, %223 : vector<2x128xf32>
    %226 = arith.divf %224, %225 : vector<2x128xf32>
    %227 = math.tanh %221 : vector<2x128xf32>
    %228 = vector.extract_strided_slice %226 {offsets = [0, 0], sizes = [2, 32], strides = [1, 1]} : vector<2x128xf32> to vector<2x32xf32>
    %229 = vector.extract_strided_slice %226 {offsets = [0, 32], sizes = [2, 32], strides = [1, 1]} : vector<2x128xf32> to vector<2x32xf32>
    %230 = vector.extract_strided_slice %227 {offsets = [0, 64], sizes = [2, 32], strides = [1, 1]} : vector<2x128xf32> to vector<2x32xf32>
    %231 = vector.extract_strided_slice %226 {offsets = [0, 96], sizes = [2, 32], strides = [1, 1]} : vector<2x128xf32> to vector<2x32xf32>
    %232 = arith.mulf %229, %218 : vector<2x32xf32>
    %233 = arith.mulf %228, %230 : vector<2x32xf32>
    %234 = arith.addf %232, %233 : vector<2x32xf32>
    %235 = math.tanh %234 : vector<2x32xf32>
    %236 = arith.mulf %231, %235 : vector<2x32xf32>
    %237 = vector.extract_strided_slice %196 {offsets = [2, 0], sizes = [2, 128], strides = [1, 1]} : vector<16x256xf32> to vector<2x128xf32>
    %cst_63 = arith.constant dense<0.000000e+00> : vector<2x128xf32>
    %238 = tpu.matmul %236, %5, %cst_63 {dimension_numbers = #tpu.dot_dimension_numbers<[1], [0], [0], [1], [0, 0, 1, 1], [], []>} : vector<2x32xf32>, vector<32x128xf32>, vector<2x128xf32> -> vector<2x128xf32>
    %239 = arith.addf %237, %238 : vector<2x128xf32>
    %240 = arith.negf %239 : vector<2x128xf32>
    %241 = math.exp %240 : vector<2x128xf32>
    %cst_64 = arith.constant 1.000000e+00 : f32
    %242 = vector.broadcast %cst_64 : f32 to vector<2x128xf32>
    %243 = arith.addf %242, %241 : vector<2x128xf32>
    %244 = arith.divf %242, %243 : vector<2x128xf32>
    %245 = math.tanh %239 : vector<2x128xf32>
    %246 = vector.extract_strided_slice %244 {offsets = [0, 0], sizes = [2, 32], strides = [1, 1]} : vector<2x128xf32> to vector<2x32xf32>
    %247 = vector.extract_strided_slice %244 {offsets = [0, 32], sizes = [2, 32], strides = [1, 1]} : vector<2x128xf32> to vector<2x32xf32>
    %248 = vector.extract_strided_slice %245 {offsets = [0, 64], sizes = [2, 32], strides = [1, 1]} : vector<2x128xf32> to vector<2x32xf32>
    %249 = vector.extract_strided_slice %244 {offsets = [0, 96], sizes = [2, 32], strides = [1, 1]} : vector<2x128xf32> to vector<2x32xf32>
    %250 = arith.mulf %247, %234 : vector<2x32xf32>
    %251 = arith.mulf %246, %248 : vector<2x32xf32>
    %252 = arith.addf %250, %251 : vector<2x32xf32>
    %253 = math.tanh %252 : vector<2x32xf32>
    %254 = arith.mulf %249, %253 : vector<2x32xf32>
    %255 = vector.extract_strided_slice %196 {offsets = [4, 0], sizes = [2, 128], strides = [1, 1]} : vector<16x256xf32> to vector<2x128xf32>
    %cst_65 = arith.constant dense<0.000000e+00> : vector<2x128xf32>
    %256 = tpu.matmul %254, %5, %cst_65 {dimension_numbers = #tpu.dot_dimension_numbers<[1], [0], [0], [1], [0, 0, 1, 1], [], []>} : vector<2x32xf32>, vector<32x128xf32>, vector<2x128xf32> -> vector<2x128xf32>
    %257 = arith.addf %255, %256 : vector<2x128xf32>
    %258 = arith.negf %257 : vector<2x128xf32>
    %259 = math.exp %258 : vector<2x128xf32>
    %cst_66 = arith.constant 1.000000e+00 : f32
    %260 = vector.broadcast %cst_66 : f32 to vector<2x128xf32>
    %261 = arith.addf %260, %259 : vector<2x128xf32>
    %262 = arith.divf %260, %261 : vector<2x128xf32>
    %263 = math.tanh %257 : vector<2x128xf32>
    %264 = vector.extract_strided_slice %262 {offsets = [0, 0], sizes = [2, 32], strides = [1, 1]} : vector<2x128xf32> to vector<2x32xf32>
    %265 = vector.extract_strided_slice %262 {offsets = [0, 32], sizes = [2, 32], strides = [1, 1]} : vector<2x128xf32> to vector<2x32xf32>
    %266 = vector.extract_strided_slice %263 {offsets = [0, 64], sizes = [2, 32], strides = [1, 1]} : vector<2x128xf32> to vector<2x32xf32>
    %267 = vector.extract_strided_slice %262 {offsets = [0, 96], sizes = [2, 32], strides = [1, 1]} : vector<2x128xf32> to vector<2x32xf32>
    %268 = arith.mulf %265, %252 : vector<2x32xf32>
    %269 = arith.mulf %264, %266 : vector<2x32xf32>
    %270 = arith.addf %268, %269 : vector<2x32xf32>
    %271 = math.tanh %270 : vector<2x32xf32>
    %272 = arith.mulf %267, %271 : vector<2x32xf32>
    %273 = vector.extract_strided_slice %196 {offsets = [6, 0], sizes = [2, 128], strides = [1, 1]} : vector<16x256xf32> to vector<2x128xf32>
    %cst_67 = arith.constant dense<0.000000e+00> : vector<2x128xf32>
    %274 = tpu.matmul %272, %5, %cst_67 {dimension_numbers = #tpu.dot_dimension_numbers<[1], [0], [0], [1], [0, 0, 1, 1], [], []>} : vector<2x32xf32>, vector<32x128xf32>, vector<2x128xf32> -> vector<2x128xf32>
    %275 = arith.addf %273, %274 : vector<2x128xf32>
    %276 = arith.negf %275 : vector<2x128xf32>
    %277 = math.exp %276 : vector<2x128xf32>
    %cst_68 = arith.constant 1.000000e+00 : f32
    %278 = vector.broadcast %cst_68 : f32 to vector<2x128xf32>
    %279 = arith.addf %278, %277 : vector<2x128xf32>
    %280 = arith.divf %278, %279 : vector<2x128xf32>
    %281 = math.tanh %275 : vector<2x128xf32>
    %282 = vector.extract_strided_slice %280 {offsets = [0, 0], sizes = [2, 32], strides = [1, 1]} : vector<2x128xf32> to vector<2x32xf32>
    %283 = vector.extract_strided_slice %280 {offsets = [0, 32], sizes = [2, 32], strides = [1, 1]} : vector<2x128xf32> to vector<2x32xf32>
    %284 = vector.extract_strided_slice %281 {offsets = [0, 64], sizes = [2, 32], strides = [1, 1]} : vector<2x128xf32> to vector<2x32xf32>
    %285 = vector.extract_strided_slice %280 {offsets = [0, 96], sizes = [2, 32], strides = [1, 1]} : vector<2x128xf32> to vector<2x32xf32>
    %286 = arith.mulf %283, %270 : vector<2x32xf32>
    %287 = arith.mulf %282, %284 : vector<2x32xf32>
    %288 = arith.addf %286, %287 : vector<2x32xf32>
    %289 = math.tanh %288 : vector<2x32xf32>
    %290 = arith.mulf %285, %289 : vector<2x32xf32>
    %291 = vector.extract_strided_slice %196 {offsets = [8, 0], sizes = [2, 128], strides = [1, 1]} : vector<16x256xf32> to vector<2x128xf32>
    %cst_69 = arith.constant dense<0.000000e+00> : vector<2x128xf32>
    %292 = tpu.matmul %290, %5, %cst_69 {dimension_numbers = #tpu.dot_dimension_numbers<[1], [0], [0], [1], [0, 0, 1, 1], [], []>} : vector<2x32xf32>, vector<32x128xf32>, vector<2x128xf32> -> vector<2x128xf32>
    %293 = arith.addf %291, %292 : vector<2x128xf32>
    %294 = arith.negf %293 : vector<2x128xf32>
    %295 = math.exp %294 : vector<2x128xf32>
    %cst_70 = arith.constant 1.000000e+00 : f32
    %296 = vector.broadcast %cst_70 : f32 to vector<2x128xf32>
    %297 = arith.addf %296, %295 : vector<2x128xf32>
    %298 = arith.divf %296, %297 : vector<2x128xf32>
    %299 = math.tanh %293 : vector<2x128xf32>
    %300 = vector.extract_strided_slice %298 {offsets = [0, 0], sizes = [2, 32], strides = [1, 1]} : vector<2x128xf32> to vector<2x32xf32>
    %301 = vector.extract_strided_slice %298 {offsets = [0, 32], sizes = [2, 32], strides = [1, 1]} : vector<2x128xf32> to vector<2x32xf32>
    %302 = vector.extract_strided_slice %299 {offsets = [0, 64], sizes = [2, 32], strides = [1, 1]} : vector<2x128xf32> to vector<2x32xf32>
    %303 = vector.extract_strided_slice %298 {offsets = [0, 96], sizes = [2, 32], strides = [1, 1]} : vector<2x128xf32> to vector<2x32xf32>
    %304 = arith.mulf %301, %288 : vector<2x32xf32>
    %305 = arith.mulf %300, %302 : vector<2x32xf32>
    %306 = arith.addf %304, %305 : vector<2x32xf32>
    %307 = math.tanh %306 : vector<2x32xf32>
    %308 = arith.mulf %303, %307 : vector<2x32xf32>
    %309 = vector.extract_strided_slice %196 {offsets = [10, 0], sizes = [2, 128], strides = [1, 1]} : vector<16x256xf32> to vector<2x128xf32>
    %cst_71 = arith.constant dense<0.000000e+00> : vector<2x128xf32>
    %310 = tpu.matmul %308, %5, %cst_71 {dimension_numbers = #tpu.dot_dimension_numbers<[1], [0], [0], [1], [0, 0, 1, 1], [], []>} : vector<2x32xf32>, vector<32x128xf32>, vector<2x128xf32> -> vector<2x128xf32>
    %311 = arith.addf %309, %310 : vector<2x128xf32>
    %312 = arith.negf %311 : vector<2x128xf32>
    %313 = math.exp %312 : vector<2x128xf32>
    %cst_72 = arith.constant 1.000000e+00 : f32
    %314 = vector.broadcast %cst_72 : f32 to vector<2x128xf32>
    %315 = arith.addf %314, %313 : vector<2x128xf32>
    %316 = arith.divf %314, %315 : vector<2x128xf32>
    %317 = math.tanh %311 : vector<2x128xf32>
    %318 = vector.extract_strided_slice %316 {offsets = [0, 0], sizes = [2, 32], strides = [1, 1]} : vector<2x128xf32> to vector<2x32xf32>
    %319 = vector.extract_strided_slice %316 {offsets = [0, 32], sizes = [2, 32], strides = [1, 1]} : vector<2x128xf32> to vector<2x32xf32>
    %320 = vector.extract_strided_slice %317 {offsets = [0, 64], sizes = [2, 32], strides = [1, 1]} : vector<2x128xf32> to vector<2x32xf32>
    %321 = vector.extract_strided_slice %316 {offsets = [0, 96], sizes = [2, 32], strides = [1, 1]} : vector<2x128xf32> to vector<2x32xf32>
    %322 = arith.mulf %319, %306 : vector<2x32xf32>
    %323 = arith.mulf %318, %320 : vector<2x32xf32>
    %324 = arith.addf %322, %323 : vector<2x32xf32>
    %325 = math.tanh %324 : vector<2x32xf32>
    %326 = arith.mulf %321, %325 : vector<2x32xf32>
    %327 = vector.extract_strided_slice %196 {offsets = [12, 0], sizes = [2, 128], strides = [1, 1]} : vector<16x256xf32> to vector<2x128xf32>
    %cst_73 = arith.constant dense<0.000000e+00> : vector<2x128xf32>
    %328 = tpu.matmul %326, %5, %cst_73 {dimension_numbers = #tpu.dot_dimension_numbers<[1], [0], [0], [1], [0, 0, 1, 1], [], []>} : vector<2x32xf32>, vector<32x128xf32>, vector<2x128xf32> -> vector<2x128xf32>
    %329 = arith.addf %327, %328 : vector<2x128xf32>
    %330 = arith.negf %329 : vector<2x128xf32>
    %331 = math.exp %330 : vector<2x128xf32>
    %cst_74 = arith.constant 1.000000e+00 : f32
    %332 = vector.broadcast %cst_74 : f32 to vector<2x128xf32>
    %333 = arith.addf %332, %331 : vector<2x128xf32>
    %334 = arith.divf %332, %333 : vector<2x128xf32>
    %335 = math.tanh %329 : vector<2x128xf32>
    %336 = vector.extract_strided_slice %334 {offsets = [0, 0], sizes = [2, 32], strides = [1, 1]} : vector<2x128xf32> to vector<2x32xf32>
    %337 = vector.extract_strided_slice %334 {offsets = [0, 32], sizes = [2, 32], strides = [1, 1]} : vector<2x128xf32> to vector<2x32xf32>
    %338 = vector.extract_strided_slice %335 {offsets = [0, 64], sizes = [2, 32], strides = [1, 1]} : vector<2x128xf32> to vector<2x32xf32>
    %339 = vector.extract_strided_slice %334 {offsets = [0, 96], sizes = [2, 32], strides = [1, 1]} : vector<2x128xf32> to vector<2x32xf32>
    %340 = arith.mulf %337, %324 : vector<2x32xf32>
    %341 = arith.mulf %336, %338 : vector<2x32xf32>
    %342 = arith.addf %340, %341 : vector<2x32xf32>
    %343 = math.tanh %342 : vector<2x32xf32>
    %344 = arith.mulf %339, %343 : vector<2x32xf32>
    %345 = vector.extract_strided_slice %196 {offsets = [14, 0], sizes = [2, 128], strides = [1, 1]} : vector<16x256xf32> to vector<2x128xf32>
    %cst_75 = arith.constant dense<0.000000e+00> : vector<2x128xf32>
    %346 = tpu.matmul %344, %5, %cst_75 {dimension_numbers = #tpu.dot_dimension_numbers<[1], [0], [0], [1], [0, 0, 1, 1], [], []>} : vector<2x32xf32>, vector<32x128xf32>, vector<2x128xf32> -> vector<2x128xf32>
    %347 = arith.addf %345, %346 : vector<2x128xf32>
    %348 = arith.negf %347 : vector<2x128xf32>
    %349 = math.exp %348 : vector<2x128xf32>
    %cst_76 = arith.constant 1.000000e+00 : f32
    %350 = vector.broadcast %cst_76 : f32 to vector<2x128xf32>
    %351 = arith.addf %350, %349 : vector<2x128xf32>
    %352 = arith.divf %350, %351 : vector<2x128xf32>
    %353 = math.tanh %347 : vector<2x128xf32>
    %354 = vector.extract_strided_slice %352 {offsets = [0, 0], sizes = [2, 32], strides = [1, 1]} : vector<2x128xf32> to vector<2x32xf32>
    %355 = vector.extract_strided_slice %352 {offsets = [0, 32], sizes = [2, 32], strides = [1, 1]} : vector<2x128xf32> to vector<2x32xf32>
    %356 = vector.extract_strided_slice %353 {offsets = [0, 64], sizes = [2, 32], strides = [1, 1]} : vector<2x128xf32> to vector<2x32xf32>
    %357 = vector.extract_strided_slice %352 {offsets = [0, 96], sizes = [2, 32], strides = [1, 1]} : vector<2x128xf32> to vector<2x32xf32>
    %358 = arith.mulf %355, %342 : vector<2x32xf32>
    %359 = arith.mulf %354, %356 : vector<2x32xf32>
    %360 = arith.addf %358, %359 : vector<2x32xf32>
    %361 = math.tanh %360 : vector<2x32xf32>
    %362 = arith.mulf %357, %361 : vector<2x32xf32>
    %363 = tpu.concatenate %362, %216 in 1 : vector<2x32xf32>, vector<2x32xf32> -> vector<2x64xf32>
    %364 = math.tanh %363 : vector<2x64xf32>
    %cst_77 = arith.constant dense<0.000000e+00> : vector<2x4xf32>
    %365 = tpu.matmul %364, %7, %cst_77 {dimension_numbers = #tpu.dot_dimension_numbers<[1], [0], [0], [1], [0, 0, 1, 1], [], []>} : vector<2x64xf32>, vector<64x4xf32>, vector<2x4xf32> -> vector<2x4xf32>
    %366 = vector.broadcast %8 : vector<1x4xf32> to vector<2x4xf32>
    %367 = arith.addf %365, %366 : vector<2x4xf32>
    %c0_78 = arith.constant 0 : index
    %c0_79 = arith.constant 0 : index
    %368 = vector.load %arg2[%c0_78, %c0_79] : memref<2x4xf32, #tpu.memory_space<vmem>>, vector<2x4xf32>
    tpu.vector_store %arg2[%c0_78, %c0_79], %367 {strides = array<i32>} : memref<2x4xf32, #tpu.memory_space<vmem>>, vector<2x4xf32>,
    return
  }
}

</mosaic_0001>

<bundles_post_ra>
// kernel: bilstm4vat_forward.1
= control target key start
LH: loop header
LB: loop body
LE: loop exit
PB: predicated region body
PF: predicated region fallthrough
CT: control target
= control target key end

     0   :  { %7 = vsyncpa [#allocation4], 0  ;;  %s3309_s0 = inlined_call_operand.vmem [shape: f32[24,64], index: 0, kind: input, shape index: {}]   ;;  %s3310_s1 = inlined_call_operand.hbm [shape: f32[280,256], index: 1, kind: input, shape index: {}]   ;;  %s3311_s2 = inlined_call_operand.hbm [shape: f32[2,4], index: 2, kind: output, shape index: {}]  }
   0x1   :  { %8 = vsyncpa [#allocation5], 0  ;;  %s2909_s9 = smov [#allocation3]   ;;  %s2861_s13 = scalar_lea.hbm %s3310_s1, 8960 }
   0x2   :  { %s16_s10 = sshll.u32 %s2909_s9, 4  ;;  %p2862_p0 = scmp.ne.s32.totalorder %s3310_s1, %s2861_s13  ;;  %s17_s10 = int_to_ptr.vmem [resolvable:$true] %s16_s10 }
   0x3   :  { %p2865_p1 = scmp.lt.u32.totalorder %s2861_s13, %s3310_s1 }
   0x5   :  { %p2867_p2 = pnand %p2865_p1, %p2862_p0 }
   0x7   :  { %2870 = shalt.err (!%p2867_p2)
}
   0x8   :  { %s2871_s18 = scalar_lea.vmem %s17_s10, 8960  ;;  %p2876_p4 = scmp.lt.s32.totalorder %s17_s10, %s17_s10 }
   0x9   :  { %p2872_p3 = scmp.ne.s32.totalorder %s17_s10, %s2871_s18  ;;  %p2877_p5 = scmp.lt.s32.totalorder %s2871_s18, %s2871_s18 }
   0xb   :  { %p2878_p6 = por %p2877_p5, %p2876_p4 }
   0xd   :  { %p2879_p7 = pnand %p2878_p6, %p2872_p3 }
   0xf   :  { %2882 = shalt.err (!%p2879_p7)
}
  0x10   :  { %s2910_s19 = smov 256   ;;  %s2911_s20 = smov 16  }
  0x11   :  { %22 = dma.hbm_to_vmem [thread:$0]  %s3310_s1, 8960, %s17_s10, [#allocation4], %s2910_s19, %s2910_s19, %s2911_s20  }
  0x12   :  { %2905 = dma.done.wait [#allocation4], 8960  }
  0x13   :  { %2906 = vsyncadd [#allocation4], 4294958336  ;;  %v2912_v0 = vmov 0.0   ;;  %v27_v1 = vld [vmem:[#allocation3 + $0x8] sm:$0xff]  ;;  %v29_v2 = vld [vmem:[#allocation3 + $0x18] sm:$0xff]  ;;  %vm104_vm0 = vcmask 261120   ;;  %v94_v41 = vlaneseq }
  0x14   :  { %175 = vmatprep.mubr.f32.mxu1 %v2912_v0  ;;  %365 = vmatprep.mubr.f32.mxu0 %v2912_v0  ;;  %v26_v3 = vld [vmem:[#allocation3] sm:$0xff]  ;;  %v2463_v4 = vpack.c.bf16 %v29_v2, %v27_v1  ;;  %v28_v5 = vld [vmem:[#allocation3 + $0x10] sm:$0xff]  ;;  %v31_v6 = vld [vmem:[#allocation3 + $0x28] sm:$0xff]  ;;  %s2913_s26 = smov 64   ;;  %vm188_vm1 = vcmask 523264   ;;  %vm295_vm2 = vcmask 254976  }
  0x15   :  { %v33_v7 = vld [vmem:[#allocation3 + $0x38] sm:$0xff]  ;;  %v2465_v8 = vpack.c.bf16 %v28_v5, %v26_v3  ;;  %v30_v10 = vld [vmem:[#allocation3 + $0x20] sm:$0xff]  ;;  %v32_v11 = vld [vmem:[#allocation3 + $0x30] sm:$0xff]  ;;  %v3009_v42 = vshrl.u32 %v94_v41, 7  ;;  %vm297_vm3 = vcmask 517376   ;;  %vm409_vm4 = vcmask 257026  }
  0x16   :  { %v2467_v9 = vpack.c.bf16 %v33_v7, %v31_v6  ;;  %2464 = vmatprep.subr.bf16.mxu1 %v2463_v4  ;;  %v35_v12 = vld [vmem:[#allocation3 + $0x48] sm:$0xff]  ;;  %v37_v13 = vld [vmem:[#allocation3 + $0x58] sm:$0xff]  ;;  %v34_v14 = vld [vmem:[#allocation3 + $0x40] sm:$0xff]  ;;  %v2469_v15 = vpack.c.bf16 %v32_v11, %v30_v10  ;;  %vm411_vm5 = vcmask 519426   ;;  %vm643_vm6 = vcmask 261126   ;;  %s2914_s5 = smov 96  }
  0x17   :  { %2466 = vmatpush1.bf16.msra.mxu1 %v2465_v8  ;;  %v2948_v16 = vpack.c.bf16 %v37_v13, %v35_v12  ;;  %v36_v17 = vld [vmem:[#allocation3 + $0x50] sm:$0xff]  ;;  %v39_v18 = vld [vmem:[#allocation3 + $0x68] sm:$0xff]  ;;  %v41_v19 = vld [vmem:[#allocation3 + $0x78] sm:$0xff]  ;;  %v96_v43 = vsub.s32 0, %v3009_v42  ;;  %v100_v46 = vsub.s32 1, %v3009_v42  ;;  %vm645_vm7 = vcmask 523526  }
  0x18   :  { %2468 = vmatprep.subr.bf16.mxu1 %v2467_v9  ;;  %v2950_v20 = vpack.c.bf16 %v36_v17, %v34_v14  ;;  %v2952_v21 = vpack.c.bf16 %v41_v19, %v39_v18  ;;  %v38_v22 = vld [vmem:[#allocation3 + $0x60] sm:$0xff]  ;;  %v40_v23 = vld [vmem:[#allocation3 + $0x70] sm:$0xff]  ;;  %v43_v25 = vld [vmem:[#allocation3 + $0x88] sm:$0xff]  ;;  %vm526_vm8 = vcmask 259076   ;;  %vm528_vm9 = vcmask 521476   ;;  %s2917_s8 = smov 32  }
  0x19   :  { %2488 = vmatprep.subr.bf16.mxu0 %v2948_v16  ;;  %v87_v24 = vld [vmem:[%s3309_s0] sm:$0xff]  ;;  %v45_v26 = vld [vmem:[#allocation3 + $0x98] sm:$0xff]  ;;  %v2961_v27 = vpack.c.bf16 %v40_v23, %v38_v22  ;;  %v90_v28 = vld [vmem:[%s3309_s0 + $0x12] sm:$0x3]  ;;  %vm2916_vm10 = vmmov 0   ;;  %vm2227_vm11 = vcmask 25600  }
  0x1a   :  { %2490 = vmatpush1.bf16.msra.mxu0 %v2950_v20  ;;  %v42_v29 = vld [vmem:[#allocation3 + $0x80] sm:$0xff]  ;;  %v44_v30 = vld [vmem:[#allocation3 + $0x90] sm:$0xff]  ;;  %279 = vrot.lane.b32.xlu0 %v90_v28, %s2913_s26  ;;  %v2968_v31 = vpack.c.bf16 %v45_v26, %v43_v25  ;;  %v88_v32 = vld [vmem:[%s3309_s0 + $0x8] sm:$0xff] }
  0x1b   :  { %2470 = vmatpush1.bf16.msra.mxu1 %v2469_v15  ;;  %2492 = vmatprep.subr.bf16.mxu0 %v2952_v21  ;;  %v47_v33 = vld [vmem:[#allocation3 + $0xa8] sm:$0xff]  ;;  %v49_v34 = vld [vmem:[#allocation3 + $0xb8] sm:$0xff]  ;;  %v2977_v35 = vpack.c.bf16 %v44_v30, %v42_v29  ;;  %v46_v36 = vld [vmem:[#allocation3 + $0xa0] sm:$0xff] }
  0x1c   :  { %2472 = vmatprep.subr.bf16.mxu1 %v2948_v16  ;;  %v48_v37 = vld [vmem:[#allocation3 + $0xb0] sm:$0xff]  ;;  %v2981_v38 = vpack.c.bf16 %v49_v34, %v47_v33  ;;  %v89_v40 = vld [vmem:[%s3309_s0 + $0x10] sm:$0x3] }
  0x1d   :  { %v2987_v39 = vpack.c.bf16 %v48_v37, %v46_v36  ;;  %v51_v44 = vld [vmem:[#allocation3 + $0xc0] ss:$8 sm:$0x3] }
  0x1e   :  { %2244 = vmatmul.mubr.msk.f32.vlgmr.msra.gmra.mrb[0].mxu1 %vm104_vm0, %v87_v24  ;;  %2494 = vmatpush1.bf16.msra.mxu0 %v2961_v27  ;;  %v97_v48 = vrot.slane %v51_v44, %v96_v43  ;;  %v101_v49 = vrot.slane %v51_v44, %v100_v46 }
  0x1f   :  { %2474 = vmatpush1.bf16.msra.mxu1 %v2950_v20  ;;  %181 = vmatprep.mubr.f32.mxu1 %v2912_v0 }
  0x20   :  { %2476 = vmatprep.subr.bf16.mxu1 %v2952_v21  ;;  %2496 = vmatprep.subr.bf16.mxu0 %v2968_v31 }
  0x22   :  { %2245 = vmatmul.mubr.msk.f32.gmra.mrb[2].mxu1 %vm104_vm0, %v88_v32  ;;  %2498 = vmatpush1.bf16.msra.mxu0 %v2977_v35 }
  0x23   :  { %2478 = vmatpush1.bf16.msra.mxu1 %v2961_v27  ;;  %256 = vmatprep.mubr.f32.mxu1 %v2912_v0 }
  0x24   :  { %2480 = vmatprep.subr.bf16.mxu1 %v2968_v31  ;;  %2500 = vmatprep.subr.bf16.mxu0 %v2981_v38 }
  0x26   :  { %2502 = vmatpush1.bf16.msra.mxu0 %v2987_v39 }
  0x27   :  { %2482 = vmatpush1.bf16.msra.mxu1 %v2977_v35  ;;  %2520 = vmatprep.subr.bf16.mxu0 %v2948_v16 }
  0x28   :  { %2484 = vmatprep.subr.bf16.mxu1 %v2981_v38 }
  0x2b   :  { %2486 = vmatpush1.bf16.msra.mxu1 %v2987_v39 }
  0x2c   :  { %2504 = vmatprep.subr.bf16.mxu1 %v2948_v16 }
  0x2e   :  { %2246 = vmatmul.mubr.msk.f32.vlgmr.msra.gmra.mrb[4].mxu1 %vm188_vm1, %v89_v40 }
  0x2f   :  { %2506 = vmatpush1.bf16.msra.mxu1 %v2950_v20  ;;  %482 = vmatprep.mubr.f32.mxu1 %v2912_v0 }
  0x30   :  { %2508 = vmatprep.subr.bf16.mxu1 %v2952_v21 }
  0x33   :  { %2510 = vmatpush1.bf16.msra.mxu1 %v2961_v27 }
  0x34   :  { %2512 = vmatprep.subr.bf16.mxu1 %v2968_v31 }
  0x37   :  { %2514 = vmatpush1.bf16.msra.mxu1 %v2977_v35 }
  0x38   :  { %2516 = vmatprep.subr.bf16.mxu1 %v2981_v38 }
  0x3b   :  { %2518 = vmatpush1.bf16.msra.mxu1 %v2987_v39 }
  0x3c   :  { %2536 = vmatprep.subr.bf16.mxu1 %v2948_v16 }
  0x8c   :  { %v280_v5 = vpop.permute.xlu0 %279 }
  0xf1   :  { %v177_v45 = vpop.f32.mrb[0].mxu1 }
  0xf2   :  { %v179_v47 = vpop.f32.mrb[1].mxu1  ;;  %v3021_v54 = vadd.f32 %v177_v45, %v97_v48 }
  0xf3   :  { %v3024_v59 = vadd.f32 %v179_v47, %v101_v49 }
  0xf5   :  { %v183_v50 = vpop.f32.mrb[2].mxu1 }
  0xf6   :  { %v3017_v51 = vadd.f32 %v183_v50, %v97_v48  ;;  %v185_v52 = vpop.f32.mrb[3].mxu1 }
  0xf7   :  { %v3019_v53 = vadd.f32 %v185_v52, %v101_v49 }
 0x101   :  { %v258_v55 = vpop.f32.mrb[4].mxu1 }
 0x102   :  { %v263_v56 = vadd.f32 %v258_v55, %v3021_v54  ;;  %v260_v57 = vpop.f32.mrb[5].mxu1 }
 0x103   :  { %v264_v60 = vadd.f32 %v260_v57, %v3024_v59 }
 0x104   :  { %v2247_v58 = vmul.f32 -1.442695, %v263_v56 }
 0x105   :  { %v2248_v3 = vmul.f32 -1.442695, %v264_v60 }
 0x106   :  { %2691 = vpow2.f32 %v2247_v58 }
 0x107   :  { %2693 = vtanh.f32 %v264_v60 }
 0x110   :  { %v2692_v61 = vpop.eup %2691 }
 0x111   :  { %v271_v62 = vadd.f32 1.0, %v2692_v61  ;;  %v2694_v63 = vpop.eup %2693 }
 0x113   :  { %2695 = vrcp.f32 %v271_v62 }
 0x114   :  { %2697 = vpow2.f32 %v2248_v3 }
 0x11d   :  { %v2696_v1 = vpop.eup %2695 }
 0x11e   :  { %v283_v2 = vmul.f32 %v2696_v1, %v2694_v63  ;;  %v2698_v4 = vpop.eup %2697  ;;  %v282_v7 = vmul.f32 %v2696_v1, %v280_v5 }
 0x11f   :  { %v272_v6 = vadd.f32 1.0, %v2698_v4 }
 0x120   :  { %285 = vrot.lane.b32.xlu0 %v283_v2, %s2913_s26 }
 0x121   :  { %2699 = vrcp.f32 %v272_v6 }
 0x12b   :  { %v2700_v10 = vpop.eup %2699 }
 0x192   :  { %v286_v8 = vpop.permute.xlu0 %285 }
 0x193   :  { %v288_v9 = vadd.f32 %v286_v8, %v282_v7 }
 0x195   :  { %2701 = vtanh.f32 %v288_v9  ;;  %v394_v28 = vrot.slane %v288_v9, 6 }
 0x19f   :  { %v2702_v11 = vpop.eup %2701 }
 0x1a0   :  { %v290_v12 = vmul.f32 %v2702_v11, %v2700_v10 }
 0x1a2   :  { %292 = vrot.lane.b32.xlu1 %v290_v12, %s2913_s26 }
 0x214   :  { %v293_v13 = vpop.permute.xlu1 %292 }
 0x215   :  { %296 = vst.msk [vmem:[#allocation2] sm:$0x3] %vm295_vm2, %v293_v13  ;;  %2249 = vmatmul.mubr.msk.f32.vlgmr.msra.gmra.mrb[0].mxu0 %vm188_vm1, %v293_v13 }
 0x216   :  { %298 = vst.msk [vmem:[#allocation2 + $0xe] sm:$0x3] %vm297_vm3, %v293_v13  ;;  %2522 = vmatpush1.bf16.msra.mxu0 %v2950_v20  ;;  %599 = vmatprep.mubr.f32.mxu0 %v2912_v0 }
 0x217   :  { %2524 = vmatprep.subr.bf16.mxu0 %v2952_v21 }
 0x21a   :  { %2526 = vmatpush1.bf16.msra.mxu0 %v2961_v27 }
 0x21b   :  { %2528 = vmatprep.subr.bf16.mxu0 %v2968_v31 }
 0x21e   :  { %2530 = vmatpush1.bf16.msra.mxu0 %v2977_v35 }
 0x21f   :  { %2532 = vmatprep.subr.bf16.mxu0 %v2981_v38 }
 0x222   :  { %2534 = vmatpush1.bf16.msra.mxu0 %v2987_v39 }
 0x223   :  { %2552 = vmatprep.subr.bf16.mxu0 %v2948_v16 }
 0x2e8   :  { %v367_v14 = vpop.f32.mrb[0].mxu0 }
 0x2e9   :  { %v374_v15 = vrot.slane %v367_v14, 6  ;;  %v369_v17 = vpop.f32.mrb[1].mxu0 }
 0x2ea   :  { %v375_v22 = vrot.slane %v369_v17, 6 }
 0x2eb   :  { %v378_v18 = vadd.f32 %v374_v15, %v3021_v54 }
 0x2ec   :  { %v379_v23 = vadd.f32 %v375_v22, %v3024_v59 }
 0x2ed   :  { %v2250_v19 = vmul.f32 -1.442695, %v378_v18 }
 0x2ee   :  { %v2251_v33 = vmul.f32 -1.442695, %v379_v23 }
 0x2ef   :  { %2703 = vpow2.f32 %v2250_v19 }
 0x2f0   :  { %2705 = vtanh.f32 %v379_v23 }
 0x2f9   :  { %v2704_v24 = vpop.eup %2703 }
 0x2fa   :  { %v386_v25 = vadd.f32 1.0, %v2704_v24  ;;  %v2706_v26 = vpop.eup %2705 }
 0x2fc   :  { %2707 = vrcp.f32 %v386_v25 }
 0x2fd   :  { %2709 = vpow2.f32 %v2251_v33 }
 0x306   :  { %v2708_v29 = vpop.eup %2707 }
 0x307   :  { %v397_v30 = vmul.f32 %v2708_v29, %v2706_v26  ;;  %v396_v32 = vmul.f32 %v2708_v29, %v394_v28  ;;  %v2710_v34 = vpop.eup %2709 }
 0x308   :  { %v387_v36 = vadd.f32 1.0, %v2710_v34 }
 0x309   :  { %399 = vrot.lane.b32.xlu1 %v397_v30, %s2913_s26 }
 0x30a   :  { %2711 = vrcp.f32 %v387_v36 }
 0x314   :  { %v2712_v41 = vpop.eup %2711 }
 0x37b   :  { %v400_v37 = vpop.permute.xlu1 %399 }
 0x37c   :  { %v402_v40 = vadd.f32 %v400_v37, %v396_v32 }
 0x37e   :  { %2713 = vtanh.f32 %v402_v40  ;;  %v511_v63 = vrot.slane %v402_v40, 6 }
 0x388   :  { %v2714_v44 = vpop.eup %2713 }
 0x389   :  { %v3044_v45 = vmul.f32 %v2714_v44, %v2712_v41 }
 0x38b   :  { %v413_v47 = vrot.slane %v3044_v45, 2 }
 0x38d   :  { %414 = vrot.lane.b32.xlu0 %v413_v47, %s2913_s26 }
 0x3ff   :  { %v415_v48 = vpop.permute.xlu0 %414 }
 0x400   :  { %2252 = vmatmul.mubr.msk.f32.vlgmr.msra.gmra.mrb[6].mxu1 %vm188_vm1, %v415_v48 }
 0x401   :  { %2538 = vmatpush1.bf16.msra.mxu1 %v2950_v20  ;;  %716 = vmatprep.mubr.f32.mxu1 %v2912_v0 }
 0x402   :  { %2540 = vmatprep.subr.bf16.mxu1 %v2952_v21 }
 0x405   :  { %2542 = vmatpush1.bf16.msra.mxu1 %v2961_v27 }
 0x406   :  { %2544 = vmatprep.subr.bf16.mxu1 %v2968_v31 }
 0x409   :  { %2546 = vmatpush1.bf16.msra.mxu1 %v2977_v35 }
 0x40a   :  { %2548 = vmatprep.subr.bf16.mxu1 %v2981_v38 }
 0x40d   :  { %2550 = vmatpush1.bf16.msra.mxu1 %v2987_v39 }
 0x40e   :  { %2568 = vmatprep.subr.bf16.mxu1 %v2948_v16 }
 0x4d3   :  { %v484_v49 = vpop.f32.mrb[6].mxu1 }
 0x4d4   :  { %v491_v50 = vrot.slane %v484_v49, 4  ;;  %v486_v52 = vpop.f32.mrb[7].mxu1 }
 0x4d5   :  { %v492_v57 = vrot.slane %v486_v52, 4 }
 0x4d6   :  { %v495_v55 = vadd.f32 %v491_v50, %v3021_v54 }
 0x4d7   :  { %v496_v58 = vadd.f32 %v492_v57, %v3024_v59 }
 0x4d8   :  { %v2253_v56 = vmul.f32 -1.442695, %v495_v55 }
 0x4d9   :  { %v2254_v4 = vmul.f32 -1.442695, %v496_v58 }
 0x4da   :  { %2715 = vpow2.f32 %v2253_v56 }
 0x4db   :  { %2717 = vtanh.f32 %v496_v58 }
 0x4e4   :  { %v2716_v60 = vpop.eup %2715 }
 0x4e5   :  { %v503_v61 = vadd.f32 1.0, %v2716_v60  ;;  %v2718_v62 = vpop.eup %2717 }
 0x4e7   :  { %2719 = vrcp.f32 %v503_v61 }
 0x4e8   :  { %2721 = vpow2.f32 %v2254_v4 }
 0x4f1   :  { %v2720_v1 = vpop.eup %2719 }
 0x4f2   :  { %v514_v2 = vmul.f32 %v2720_v1, %v2718_v62  ;;  %v513_v3 = vmul.f32 %v2720_v1, %v511_v63  ;;  %v2722_v5 = vpop.eup %2721 }
 0x4f3   :  { %v504_v6 = vadd.f32 1.0, %v2722_v5 }
 0x4f4   :  { %516 = vrot.lane.b32.xlu1 %v514_v2, %s2913_s26 }
 0x4f5   :  { %2723 = vrcp.f32 %v504_v6 }
 0x4ff   :  { %v2724_v9 = vpop.eup %2723 }
 0x566   :  { %v517_v7 = vpop.permute.xlu1 %516 }
 0x567   :  { %v519_v8 = vadd.f32 %v517_v7, %v513_v3 }
 0x569   :  { %2725 = vtanh.f32 %v519_v8  ;;  %v628_v28 = vrot.slane %v519_v8, 6 }
 0x573   :  { %v2726_v10 = vpop.eup %2725 }
 0x574   :  { %v3061_v11 = vmul.f32 %v2726_v10, %v2724_v9 }
 0x576   :  { %v530_v12 = vrot.slane %v3061_v11, 4 }
 0x578   :  { %531 = vrot.lane.b32.xlu0 %v530_v12, %s2913_s26 }
 0x5ea   :  { %v532_v13 = vpop.permute.xlu0 %531 }
 0x5eb   :  { %2255 = vmatmul.mubr.msk.f32.vlgmr.msra.gmra.mrb[2].mxu0 %vm188_vm1, %v532_v13 }
 0x5ec   :  { %2554 = vmatpush1.bf16.msra.mxu0 %v2950_v20  ;;  %822 = vmatprep.mubr.f32.mxu0 %v2912_v0 }
 0x5ed   :  { %2556 = vmatprep.subr.bf16.mxu0 %v2952_v21 }
 0x5f0   :  { %2558 = vmatpush1.bf16.msra.mxu0 %v2961_v27 }
 0x5f1   :  { %2560 = vmatprep.subr.bf16.mxu0 %v2968_v31 }
 0x5f4   :  { %2562 = vmatpush1.bf16.msra.mxu0 %v2977_v35 }
 0x5f5   :  { %2564 = vmatprep.subr.bf16.mxu0 %v2981_v38 }
 0x5f8   :  { %2566 = vmatpush1.bf16.msra.mxu0 %v2987_v39 }
 0x5f9   :  { %2584 = vmatprep.subr.bf16.mxu0 %v2948_v16 }
 0x6be   :  { %v601_v14 = vpop.f32.mrb[2].mxu0 }
 0x6bf   :  { %v608_v15 = vrot.slane %v601_v14, 2  ;;  %v603_v17 = vpop.f32.mrb[3].mxu0 }
 0x6c0   :  { %v609_v22 = vrot.slane %v603_v17, 2 }
 0x6c1   :  { %v612_v18 = vadd.f32 %v608_v15, %v3021_v54 }
 0x6c2   :  { %v613_v23 = vadd.f32 %v609_v22, %v3024_v59 }
 0x6c3   :  { %v2256_v19 = vmul.f32 -1.442695, %v612_v18 }
 0x6c4   :  { %v2257_v16 = vmul.f32 -1.442695, %v613_v23 }
 0x6c5   :  { %2727 = vpow2.f32 %v2256_v19 }
 0x6c6   :  { %2729 = vtanh.f32 %v613_v23 }
 0x6cf   :  { %v2728_v24 = vpop.eup %2727 }
 0x6d0   :  { %v620_v25 = vadd.f32 1.0, %v2728_v24  ;;  %v2730_v26 = vpop.eup %2729 }
 0x6d2   :  { %2731 = vrcp.f32 %v620_v25 }
 0x6d3   :  { %2733 = vpow2.f32 %v2257_v16 }
 0x6dc   :  { %v2732_v29 = vpop.eup %2731 }
 0x6dd   :  { %v631_v30 = vmul.f32 %v2732_v29, %v2730_v26  ;;  %v630_v32 = vmul.f32 %v2732_v29, %v628_v28  ;;  %v2734_v33 = vpop.eup %2733 }
 0x6de   :  { %v621_v54 = vadd.f32 1.0, %v2734_v33 }
 0x6df   :  { %633 = vrot.lane.b32.xlu1 %v631_v30, %s2913_s26 }
 0x6e0   :  { %2735 = vrcp.f32 %v621_v54 }
 0x6ea   :  { %v2736_v59 = vpop.eup %2735 }
 0x751   :  { %v634_v34 = vpop.permute.xlu1 %633 }
 0x752   :  { %v636_v36 = vadd.f32 %v634_v34, %v630_v32 }
 0x754   :  { %2737 = vtanh.f32 %v636_v36  ;;  %v739_v58 = vrot.slane %v636_v36, 6 }
 0x75e   :  { %v2738_v37 = vpop.eup %2737 }
 0x75f   :  { %v3078_v40 = vmul.f32 %v2738_v37, %v2736_v59 }
 0x761   :  { %v647_v41 = vrot.slane %v3078_v40, 6 }
 0x763   :  { %648 = vrot.lane.b32.xlu0 %v647_v41, %s2913_s26 }
 0x7d5   :  { %v649_v44 = vpop.permute.xlu0 %648 }
 0x7d6   :  { %2258 = vmatmul.mubr.msk.f32.vlgmr.msra.gmra.mrb[8].mxu1 %vm188_vm1, %v649_v44 }
 0x7d7   :  { %2570 = vmatpush1.bf16.msra.mxu1 %v2950_v20  ;;  %937 = vmatprep.mubr.f32.mxu1 %v2912_v0 }
 0x7d8   :  { %2572 = vmatprep.subr.bf16.mxu1 %v2952_v21 }
 0x7db   :  { %2574 = vmatpush1.bf16.msra.mxu1 %v2961_v27 }
 0x7dc   :  { %2576 = vmatprep.subr.bf16.mxu1 %v2968_v31 }
 0x7df   :  { %2578 = vmatpush1.bf16.msra.mxu1 %v2977_v35 }
 0x7e0   :  { %2580 = vmatprep.subr.bf16.mxu1 %v2981_v38 }
 0x7e3   :  { %2582 = vmatpush1.bf16.msra.mxu1 %v2987_v39 }
 0x8a9   :  { %v718_v47 = vpop.f32.mrb[8].mxu1 }
 0x8aa   :  { %v723_v48 = vadd.f32 %v718_v47, %v3017_v51  ;;  %v720_v49 = vpop.f32.mrb[9].mxu1 }
 0x8ab   :  { %v724_v52 = vadd.f32 %v720_v49, %v3019_v53 }
 0x8ac   :  { %v2259_v50 = vmul.f32 -1.442695, %v723_v48 }
 0x8ad   :  { %v2260_v63 = vmul.f32 -1.442695, %v724_v52 }
 0x8ae   :  { %2739 = vpow2.f32 %v2259_v50 }
 0x8af   :  { %2741 = vtanh.f32 %v724_v52 }
 0x8b8   :  { %v2740_v55 = vpop.eup %2739 }
 0x8b9   :  { %v731_v56 = vadd.f32 1.0, %v2740_v55  ;;  %v2742_v57 = vpop.eup %2741 }
 0x8bb   :  { %2743 = vrcp.f32 %v731_v56 }
 0x8bc   :  { %2745 = vpow2.f32 %v2260_v63 }
 0x8c5   :  { %v2744_v60 = vpop.eup %2743 }
 0x8c6   :  { %v742_v61 = vmul.f32 %v2744_v60, %v2742_v57  ;;  %v741_v62 = vmul.f32 %v2744_v60, %v739_v58  ;;  %v2746_v1 = vpop.eup %2745 }
 0x8c7   :  { %v732_v2 = vadd.f32 1.0, %v2746_v1 }
 0x8c8   :  { %744 = vrot.lane.b32.xlu1 %v742_v61, %s2913_s26 }
 0x8c9   :  { %2747 = vrcp.f32 %v732_v2 }
 0x8d3   :  { %v2748_v5 = vpop.eup %2747 }
 0x93a   :  { %v745_v3 = vpop.permute.xlu1 %744 }
 0x93b   :  { %v747_v4 = vadd.f32 %v745_v3, %v741_v62 }
 0x93d   :  { %2749 = vtanh.f32 %v747_v4 }
 0x947   :  { %v2750_v6 = vpop.eup %2749 }
 0x948   :  { %v749_v7 = vmul.f32 %v2750_v6, %v2748_v5 }
 0x94a   :  { %751 = vrot.lane.b32.xlu0 %v749_v7, %s2913_s26 }
 0x9bc   :  { %v3095_v8 = vpop.permute.xlu0 %751 }
 0x9bd   :  { %2261 = vmatmul.mubr.msk.f32.vlgmr.msra.gmra.mrb[4].mxu0 %vm188_vm1, %v3095_v8 }
 0x9be   :  { %2586 = vmatpush1.bf16.msra.mxu0 %v2950_v20  ;;  %1052 = vmatprep.mubr.f32.mxu0 %v2912_v0 }
 0x9bf   :  { %2588 = vmatprep.subr.bf16.mxu0 %v2952_v21 }
 0x9c2   :  { %2590 = vmatpush1.bf16.msra.mxu0 %v2961_v27 }
 0x9c3   :  { %2592 = vmatprep.subr.bf16.mxu0 %v2968_v31 }
 0x9c6   :  { %2594 = vmatpush1.bf16.msra.mxu0 %v2977_v35  ;;  %v851_v35 = vrot.slane %v747_v4, 6 }
 0x9c7   :  { %2596 = vmatprep.subr.bf16.mxu0 %v2981_v38 }
 0x9ca   :  { %2598 = vmatpush1.bf16.msra.mxu0 %v2987_v39 }
 0xa90   :  { %v824_v9 = vpop.f32.mrb[4].mxu0 }
 0xa91   :  { %v831_v10 = vrot.slane %v824_v9, 6  ;;  %v826_v12 = vpop.f32.mrb[5].mxu0 }
 0xa92   :  { %v832_v14 = vrot.slane %v826_v12, 6 }
 0xa93   :  { %v835_v13 = vadd.f32 %v831_v10, %v3017_v51 }
 0xa94   :  { %v836_v21 = vadd.f32 %v832_v14, %v3019_v53 }
 0xa95   :  { %v2262_v20 = vmul.f32 -1.442695, %v835_v13 }
 0xa96   :  { %v2263_v39 = vmul.f32 -1.442695, %v836_v21 }
 0xa97   :  { %2751 = vpow2.f32 %v2262_v20 }
 0xa98   :  { %2753 = vtanh.f32 %v836_v21 }
 0xaa1   :  { %v2752_v15 = vpop.eup %2751 }
 0xaa2   :  { %v843_v27 = vadd.f32 1.0, %v2752_v15  ;;  %v2754_v31 = vpop.eup %2753 }
 0xaa4   :  { %2755 = vrcp.f32 %v843_v27  ;;  %v53_v27 = vld [vmem:[#allocation3 + $0xd8] sm:$0xff] }
 0xaa5   :  { %2757 = vpow2.f32 %v2263_v39 }
 0xaae   :  { %v2756_v17 = vpop.eup %2755 }
 0xaaf   :  { %v854_v38 = vmul.f32 %v2756_v17, %v2754_v31  ;;  %v853_v18 = vmul.f32 %v2756_v17, %v851_v35  ;;  %v2758_v19 = vpop.eup %2757  ;;  %v55_v31 = vld [vmem:[#allocation3 + $0xe8] sm:$0xff]  ;;  %v52_v35 = vld [vmem:[#allocation3 + $0xd0] sm:$0xff]  ;;  %v54_v17 = vld [vmem:[#allocation3 + $0xe0] sm:$0xff] }
 0xab0   :  { %v844_v22 = vadd.f32 1.0, %v2758_v19  ;;  %v2601_v39 = vpack.c.bf16 %v54_v17, %v52_v35  ;;  %v75_v19 = vld [vmem:[#allocation3 + $0x178] sm:$0xff] }
 0xab1   :  { %856 = vrot.lane.b32.xlu1 %v854_v38, %s2913_s26  ;;  %v2915_v38 = vmov 0.0|0.0  }
 0xab2   :  { %2759 = vrcp.f32 %v844_v22  ;;  %2615 = vmatprep.subr.bf16.mxu0 %v2915_v38  ;;  %v57_v22 = vld [vmem:[#allocation3 + $0xf8] sm:$0xff] }
 0xabc   :  { %v2760_v25 = vpop.eup %2759 }
 0xb23   :  { %v857_v23 = vpop.permute.xlu1 %856 }
 0xb24   :  { %v859_v24 = vadd.f32 %v857_v23, %v853_v18  ;;  %v74_v18 = vld [vmem:[#allocation3 + $0x168] sm:$0xff] }
 0xb25   :  { %v59_v23 = vld [vmem:[#allocation3 + $0x108] sm:$0xff] }
 0xb26   :  { %2761 = vtanh.f32 %v859_v24  ;;  %v966_v47 = vrot.slane %v859_v24, 6  ;;  %v2616_v24 = vpack.c.bf16 %v75_v19, %v74_v18 }
 0xb30   :  { %v2762_v26 = vpop.eup %2761 }
 0xb31   :  { %v3110_v28 = vmul.f32 %v2762_v26, %v2760_v25  ;;  %v2603_v25 = vpack.c.bf16 %v59_v23, %v57_v22  ;;  %v56_v26 = vld [vmem:[#allocation3 + $0xf0] sm:$0xff] }
 0xb33   :  { %v868_v29 = vrot.slane %v3110_v28, 2 }
 0xb35   :  { %869 = vrot.lane.b32.xlu0 %v868_v29, %s2913_s26  ;;  %v58_v29 = vld [vmem:[#allocation3 + $0x100] sm:$0xff] }
 0xba7   :  { %v870_v30 = vpop.permute.xlu0 %869 }
 0xba8   :  { %2264 = vmatmul.mubr.msk.f32.vlgmr.msra.gmra.mrb[10].mxu1 %vm188_vm1, %v870_v30  ;;  %v76_v30 = vld [vmem:[#allocation3 + $0x188] sm:$0xff] }
 0xba9   :  { %1181 = vmatprep.mubr.f32.mxu1 %v2912_v0 }
 0xc7b   :  { %v939_v32 = vpop.f32.mrb[10].mxu1 }
 0xc7c   :  { %v946_v16 = vrot.slane %v939_v32, 4  ;;  %v941_v33 = vpop.f32.mrb[11].mxu1  ;;  %v2605_v32 = vpack.c.bf16 %v58_v29, %v56_v26 }
 0xc7d   :  { %v947_v36 = vrot.slane %v941_v33, 4 }
 0xc7e   :  { %v950_v54 = vadd.f32 %v946_v16, %v3017_v51  ;;  %v77_v16 = vld [vmem:[#allocation3 + $0x198] sm:$0xff] }
 0xc7f   :  { %v951_v59 = vadd.f32 %v947_v36, %v3019_v53  ;;  %v2619_v33 = vpack.c.bf16 %v77_v16, %v76_v30 }
 0xc80   :  { %v2265_v34 = vmul.f32 -1.442695, %v950_v54 }
 0xc81   :  { %v2266_v52 = vmul.f32 -1.442695, %v951_v59 }
 0xc82   :  { %2763 = vpow2.f32 %v2265_v34 }
 0xc83   :  { %2765 = vtanh.f32 %v951_v59  ;;  %v61_v59 = vld [vmem:[#allocation3 + $0x118] sm:$0xff] }
 0xc8c   :  { %v2764_v37 = vpop.eup %2763 }
 0xc8d   :  { %v958_v41 = vadd.f32 1.0, %v2764_v37  ;;  %v2766_v44 = vpop.eup %2765  ;;  %v63_v37 = vld [vmem:[#allocation3 + $0x128] sm:$0xff] }
 0xc8f   :  { %2767 = vrcp.f32 %v958_v41 }
 0xc90   :  { %2769 = vpow2.f32 %v2266_v52 }
 0xc99   :  { %v2768_v48 = vpop.eup %2767 }
 0xc9a   :  { %v969_v49 = vmul.f32 %v2768_v48, %v2766_v44  ;;  %v968_v50 = vmul.f32 %v2768_v48, %v966_v47  ;;  %v2770_v55 = vpop.eup %2769  ;;  %v2607_v44 = vpack.c.bf16 %v63_v37, %v61_v59  ;;  %v60_v47 = vld [vmem:[#allocation3 + $0x110] sm:$0xff]  ;;  %v62_v48 = vld [vmem:[#allocation3 + $0x120] sm:$0xff] }
 0xc9b   :  { %v959_v56 = vadd.f32 1.0, %v2770_v55 }
 0xc9c   :  { %971 = vrot.lane.b32.xlu1 %v969_v49, %s2913_s26  ;;  %v2609_v49 = vpack.c.bf16 %v62_v48, %v60_v47 }
 0xc9d   :  { %2771 = vrcp.f32 %v959_v56  ;;  %v65_v56 = vld [vmem:[#allocation3 + $0x138] sm:$0xff] }
 0xca7   :  { %v2772_v60 = vpop.eup %2771 }
 0xd0e   :  { %v972_v57 = vpop.permute.xlu1 %971 }
 0xd0f   :  { %v974_v58 = vadd.f32 %v972_v57, %v968_v50  ;;  %v71_v50 = vld [vmem:[#allocation3 + $0x170] sm:$0xff]  ;;  %v67_v57 = vld [vmem:[#allocation3 + $0x148] sm:$0xff] }
 0xd11   :  { %2773 = vtanh.f32 %v974_v58  ;;  %v1081_v20 = vrot.slane %v974_v58, 6  ;;  %v64_v58 = vld [vmem:[#allocation3 + $0x130] sm:$0xff] }
 0xd1b   :  { %v2774_v61 = vpop.eup %2773 }
 0xd1c   :  { %v976_v62 = vmul.f32 %v2774_v61, %v2772_v60  ;;  %v2611_v61 = vpack.c.bf16 %v67_v57, %v65_v56 }
 0xd1e   :  { %v983_v63 = vrot.slane %v976_v62, 4 }
 0xd20   :  { %984 = vrot.lane.b32.xlu0 %v983_v63, %s2913_s26  ;;  %v72_v63 = vld [vmem:[#allocation3 + $0x180] sm:$0xff] }
 0xd24   :  { %406 = vrot.lane.b32.xlu0 %v3044_v45, %s2913_s26 }
 0xd28   :  { %640 = vrot.lane.b32.xlu0 %v3078_v40, %s2913_s26 }
 0xd2c   :  { %978 = vrot.lane.b32.xlu0 %v976_v62, %s2913_s26  ;;  %v66_v62 = vld [vmem:[#allocation3 + $0x140] sm:$0xff] }
 0xd92   :  { %v985_v1 = vpop.permute.xlu0 %984 }
 0xd93   :  { %2267 = vmatmul.mubr.msk.f32.vlgmr.msra.gmra.mrb[6].mxu0 %vm188_vm1, %v985_v1  ;;  %v73_v1 = vld [vmem:[#allocation3 + $0x190] sm:$0xff] }
 0xd94   :  { %2617 = vmatpush3.bf16.msra.mxu0 %v2616_v24  ;;  %2353 = vmatprep.mubr.msk.f32.mxu0 %vm2916_vm10, %v2912_v0 }
 0xd95   :  { %2618 = vmatprep.subr.bf16.mxu0 %v2915_v38 }
 0xd96   :  { %v407_v2 = vpop.permute.xlu0 %406 }
 0xd97   :  { %410 = vst.msk [vmem:[#allocation2] sm:$0xc] %vm409_vm4, %v407_v2 }
 0xd98   :  { %412 = vst.msk [vmem:[#allocation2 + $0xa] sm:$0xc] %vm411_vm5, %v407_v2  ;;  %2620 = vmatpush3.bf16.msra.mxu0 %v2619_v33  ;;  %v2613_v2 = vpack.c.bf16 %v66_v62, %v64_v58 }
 0xd99   :  { %2621 = vmatprep.subr.bf16.mxu0 %v2915_v38 }
 0xd9a   :  { %v641_v3 = vpop.permute.xlu0 %640 }
 0xd9b   :  { %644 = vst.msk [vmem:[#allocation2] sm:$0xc0] %vm643_vm6, %v641_v3 }
 0xd9c   :  { %646 = vst.msk [vmem:[#allocation2 + $0x2] sm:$0xc0] %vm645_vm7, %v641_v3  ;;  %v3160_v3 = vpack.c.bf16 %v73_v1, %v72_v63 }
 0xd9d   :  { %754 = vst.msk [vmem:[#allocation2 + $0x8] sm:$0x3] %vm295_vm2, %v3095_v8 }
 0xd9e   :  { %755 = vst.msk [vmem:[#allocation2 + $0x6] sm:$0x3] %vm297_vm3, %v3095_v8  ;;  %v979_v45 = vpop.permute.xlu0 %978 }
 0xd9f   :  { %981 = vst.msk [vmem:[#allocation2 + $0x8] sm:$0x30] %vm526_vm8, %v979_v45 }
 0xda0   :  { %982 = vst.msk [vmem:[#allocation2 - $0x2] sm:$0x30] %vm528_vm9, %v979_v45 }
 0xe66   :  { %v1054_v40 = vpop.f32.mrb[6].mxu0 }
 0xe67   :  { %v1061_v4 = vrot.slane %v1054_v40, 2  ;;  %v1056_v5 = vpop.f32.mrb[7].mxu0 }
 0xe68   :  { %v1062_v9 = vrot.slane %v1056_v5, 2 }
 0xe69   :  { %v1065_v6 = vadd.f32 %v1061_v4, %v3017_v51  ;;  %v3142_v51 = vld [vmem:[%s3309_s0 + $0x14] sm:$0x3] }
 0xe6a   :  { %v1066_v10 = vadd.f32 %v1062_v9, %v3019_v53  ;;  %1194 = vrot.lane.b32.xlu0 %v3142_v51, %s2914_s5  ;;  %v2599_v53 = vpack.c.bf16 %v55_v31, %v53_v27 }
 0xe6b   :  { %v2268_v7 = vmul.f32 -1.442695, %v1065_v6  ;;  %v3178_v6 = vld [vmem:[%s3309_s0 + $0x16] sm:$0x3]  ;;  %s2918_s0 = smov [#allocation6]  }
 0xe6c   :  { %2600 = vmatprep.subr.bf16.mxu1 %v2599_v53  ;;  %s2235_s9 = sshll.u32 %s2918_s0, 4  ;;  %s2236_s9 = int_to_ptr.vmem [resolvable:$true] %s2235_s9 }
 0xe6d   :  { %2775 = vpow2.f32 %v2268_v7  ;;  %2602 = vmatpush1.bf16.msra.mxu1 %v2601_v39  ;;  %s2883_s10 = scalar_lea.vmem %s2236_s9, 32  ;;  %p2888_p9 = scmp.lt.s32.totalorder %s2236_s9, %s2236_s9 }
 0xe6e   :  { %2777 = vtanh.f32 %v1066_v10  ;;  %2604 = vmatprep.subr.bf16.mxu1 %v2603_v25  ;;  %1379 = vrot.lane.b32.xlu0 %v3178_v6, %s2917_s8  ;;  %p2884_p8 = scmp.ne.s32.totalorder %s2236_s9, %s2883_s10  ;;  %p2889_p10 = scmp.lt.s32.totalorder %s2883_s10, %s2883_s10 }
 0xe70   :  { %p2890_p11 = por %p2889_p10, %p2888_p9 }
 0xe71   :  { %2606 = vmatpush1.bf16.msra.mxu1 %v2605_v32 }
 0xe72   :  { %2608 = vmatprep.subr.bf16.mxu1 %v2607_v44  ;;  %p2891_p12 = pnand %p2890_p11, %p2884_p8 }
 0xe75   :  { %2610 = vmatpush1.bf16.msra.mxu1 %v2609_v49 }
 0xe76   :  { %2612 = vmatprep.subr.bf16.mxu1 %v2611_v61 }
 0xe77   :  { %v2776_v12 = vpop.eup %2775 }
 0xe78   :  { %v1073_v13 = vadd.f32 1.0, %v2776_v12  ;;  %v2778_v8 = vpop.eup %2777 }
 0xe79   :  { %2614 = vmatpush1.bf16.msra.mxu1 %v2613_v2 }
 0xe7a   :  { %2779 = vrcp.f32 %v1073_v13  ;;  %2627 = vmatprep.subr.bf16.mxu1 %v2915_v38 }
 0xe84   :  { %v2780_v14 = vpop.eup %2779 }
 0xe85   :  { %v1084_v21 = vmul.f32 %v2780_v14, %v2778_v8  ;;  %v1083_v15 = vmul.f32 %v2780_v14, %v1081_v20  ;;  %v69_v14 = vld [vmem:[#allocation3 + $0x150] ss:$8 sm:$0x3] }
 0xe86   :  { %v1108_v31 = vrot.slane %v69_v14, %v100_v46 }
 0xe87   :  { %1086 = vrot.lane.b32.xlu1 %v1084_v21, %s2913_s26  ;;  %v1104_v21 = vrot.slane %v69_v14, %v96_v43 }
 0xe8b   :  { %523 = vrot.lane.b32.xlu1 %v3061_v11, %s2913_s26  ;;  %v2269_v11 = vmul.f32 -1.442695, %v1066_v10 }
 0xe8d   :  { %2781 = vpow2.f32 %v2269_v11 }
 0xe8f   :  { %863 = vrot.lane.b32.xlu1 %v3110_v28, %s2913_s26  ;;  %v70_v28 = vld [vmem:[#allocation3 + $0x160] sm:$0xff] }
 0xe90   :  { %v3152_v55 = vpack.c.bf16 %v71_v50, %v70_v28 }
 0xe97   :  { %v2782_v54 = vpop.eup %2781 }
 0xe98   :  { %v1074_v34 = vadd.f32 1.0, %v2782_v54 }
 0xe9a   :  { %2783 = vrcp.f32 %v1074_v34 }
 0xea4   :  { %v2784_v40 = vpop.eup %2783 }
 0xedc   :  { %v1195_v52 = vpop.permute.xlu0 %1194 }
 0xedd   :  { %2354 = vmatmul.mubr.msk.f32.vlgmr.msra.gmra.mrb[8].mxu0 %vm104_vm0, %v1195_v52 }
 0xede   :  { %2623 = vmatpush3.bf16.msra.mxu0 %v3152_v55  ;;  %2364 = vmatprep.mubr.msk.f32.mxu0 %vm2916_vm10, %v2912_v0 }
 0xedf   :  { %2624 = vmatprep.subr.bf16.mxu0 %v2915_v38 }
 0xee0   :  { %v1380_v29 = vpop.permute.xlu0 %1379 }
 0xee2   :  { %2626 = vmatpush3.bf16.msra.mxu0 %v3160_v3 }
 0xee3   :  { %2633 = vmatprep.subr.bf16.mxu0 %v2915_v38 }
 0xee5   :  { %2365 = vmatmul.mubr.msk.f32.vlgmr.msra.gmra.mrb[10].mxu0 %vm104_vm0, %v3142_v51 }
 0xee6   :  { %2635 = vmatpush3.bf16.msra.mxu0 %v3152_v55  ;;  %2386 = vmatprep.mubr.msk.f32.mxu0 %vm2916_vm10, %v2912_v0 }
 0xee7   :  { %2636 = vmatprep.subr.bf16.mxu0 %v2915_v38 }
 0xeea   :  { %2638 = vmatpush3.bf16.msra.mxu0 %v3160_v3 }
 0xeeb   :  { %2645 = vmatprep.subr.bf16.mxu0 %v2915_v38 }
 0xef9   :  { %v1087_v36 = vpop.permute.xlu1 %1086 }
 0xefa   :  { %v1089_v41 = vadd.f32 %v1087_v36, %v1083_v15 }
 0xefc   :  { %2785 = vtanh.f32 %v1089_v41 }
 0xefd   :  { %v524_v60 = vpop.permute.xlu1 %523 }
 0xefe   :  { %527 = vst.msk [vmem:[#allocation2] sm:$0x30] %vm526_vm8, %v524_v60 }
 0xeff   :  { %529 = vst.msk [vmem:[#allocation2 + $0x6] sm:$0x30] %vm528_vm9, %v524_v60 }
 0xf01   :  { %v864_v45 = vpop.permute.xlu1 %863 }
 0xf02   :  { %866 = vst.msk [vmem:[#allocation2 + $0x8] sm:$0xc] %vm409_vm4, %v864_v45 }
 0xf03   :  { %867 = vst.msk [vmem:[#allocation2 + $0x2] sm:$0xc] %vm411_vm5, %v864_v45 }
 0xf06   :  { %v2786_v4 = vpop.eup %2785 }
 0xf07   :  { %v1091_v5 = vmul.f32 %v2786_v4, %v2784_v40 }
 0xf09   :  { %1093 = vrot.lane.b32.xlu1 %v1091_v5, %s2913_s26 }
 0xf7b   :  { %v1094_v7 = vpop.permute.xlu1 %1093 }
 0xf7c   :  { %1096 = vst.msk [vmem:[#allocation2 + $0x8] sm:$0xc0] %vm643_vm6, %v1094_v7 }
 0xf7d   :  { %1097 = vst.msk [vmem:[#allocation2 - $0x6] sm:$0xc0] %vm645_vm7, %v1094_v7 }
 0xf83   :  { %v1099_v10 = vld [vmem:[#allocation2 + $0x8] sm:$0xff] }
 0xf84   :  { %v1098_v9 = vld [vmem:[#allocation2] sm:$0xff] }
 0xf85   :  { %2270 = vmatmul.mubr.msk.f32.vlgmr.msra.gmra.mrb[12].mxu1 %vm188_vm1, %v1098_v9 }
 0xf86   :  { %1186 = vmatprep.mubr.f32.mxu1 %v2912_v0  ;;  %2629 = vmatpush3.bf16.msra.mxu1 %v3152_v55 }
 0xf87   :  { %2630 = vmatprep.subr.bf16.mxu1 %v2915_v38 }
 0xf89   :  { %2271 = vmatmul.mubr.msk.f32.gmra.mrb[14].mxu1 %vm188_vm1, %v1099_v10 }
 0xf8a   :  { %2632 = vmatpush3.bf16.msra.mxu1 %v3160_v3  ;;  %2375 = vmatprep.mubr.msk.f32.mxu1 %vm2916_vm10, %v2912_v0 }
 0xf8b   :  { %2639 = vmatprep.subr.bf16.mxu1 %v2915_v38 }
 0xfb0   :  { %v1264_v12 = vpop.f32.mrb[8].mxu0 }
 0xfb1   :  { %v2355_v13 = vpop.f32.mrb[9].mxu0  ;;  %v1269_v39 = vrot.slane %v1264_v12, 2 }
 0xfb8   :  { %v1367_v8 = vpop.f32.mrb[10].mxu0 }
 0xfb9   :  { %v2366_v20 = vpop.f32.mrb[11].mxu0 }
0x1058   :  { %v1183_v15 = vpop.f32.mrb[12].mxu1 }
0x1059   :  { %v3199_v51 = vadd.f32 %v1183_v15, %v1104_v21  ;;  %v1185_v27 = vpop.f32.mrb[13].mxu1 }
0x105b   :  { %v1371_v53 = vadd.f32 %v1367_v8, %v3199_v51 }
0x105c   :  { %v1188_v35 = vpop.f32.mrb[14].mxu1 }
0x105d   :  { %2787 = vtanh.f32 %v1371_v53  ;;  %v3204_v17 = vadd.f32 %v1188_v35, %v1104_v21  ;;  %v1190_v18 = vpop.f32.mrb[15].mxu1  ;;  %v2275_v43 = vmul.f32 -1.442695, %v1371_v53 }
0x105e   :  { %v1191_v19 = vadd.f32 %v1190_v18, %v1108_v31 }
0x105f   :  { %2789 = vpow2.f32 %v2275_v43 }
0x1060   :  { %v3206_v22 = vadd.f32 %v1269_v39, %v1191_v19 }
0x1067   :  { %v2788_v23 = vpop.eup %2787 }
0x1068   :  { %1384 = vrot.lane.b32.xlu1 %v2788_v23, %s2913_s26 }
0x1069   :  { %v2790_v24 = vpop.eup %2789 }
0x106a   :  { %v1375_v25 = vadd.f32 1.0, %v2790_v24 }
0x106c   :  { %2791 = vrcp.f32 %v1375_v25 }
0x1076   :  { %v2792_v42 = vpop.eup %2791 }
0x1077   :  { %v1382_v30 = vmul.f32 %v2792_v42, %v1380_v29 }
0x10da   :  { %v1385_v46 = vpop.permute.xlu1 %1384 }
0x10db   :  { %v1387_v26 = vmul.f32 %v2792_v42, %v1385_v46 }
0x10dd   :  { %1389 = vrot.lane.b32.xlu1 %v1387_v26, %s2917_s8 }
0x114f   :  { %v1390_v32 = vpop.permute.xlu1 %1389 }
0x1150   :  { %v1392_v16 = vadd.f32 %v1390_v32, %v1382_v30 }
0x1152   :  { %2793 = vtanh.f32 %v1392_v16  ;;  %v1486_v56 = vrot.slane %v1392_v16, 6 }
0x115c   :  { %v2794_v33 = vpop.eup %2793 }
0x115d   :  { %1395 = vrot.lane.b32.xlu0 %v2794_v33, %s2913_s26 }
0x11cf   :  { %v1396_v11 = vpop.permute.xlu0 %1395 }
0x11d0   :  { %v1398_v54 = vmul.f32 %v2792_v42, %v1396_v11 }
0x11d2   :  { %1400 = vrot.lane.b32.xlu1 %v1398_v54, %s2917_s8 }
0x1244   :  { %v1401_v34 = vpop.permute.xlu1 %1400 }
0x1245   :  { %2376 = vmatmul.mubr.msk.f32.vlgmr.msra.gmra.mrb[16].mxu1 %vm104_vm0, %v1401_v34 }
0x1246   :  { %2641 = vmatpush3.bf16.msra.mxu1 %v3152_v55  ;;  %2397 = vmatprep.mubr.msk.f32.mxu1 %vm2916_vm10, %v2912_v0 }
0x1247   :  { %2642 = vmatprep.subr.bf16.mxu1 %v2915_v38 }
0x124a   :  { %2644 = vmatpush3.bf16.msra.mxu1 %v3160_v3 }
0x124b   :  { %2651 = vmatprep.subr.bf16.mxu1 %v2915_v38 }
0x1318   :  { %v1470_v36 = vpop.f32.mrb[16].mxu1 }
0x1319   :  { %v1475_v59 = vrot.slane %v1470_v36, 6  ;;  %v2377_v37 = vpop.f32.mrb[17].mxu1 }
0x131b   :  { %v1477_v41 = vadd.f32 %v1475_v59, %v3199_v51 }
0x131d   :  { %2795 = vtanh.f32 %v1477_v41  ;;  %v2277_v47 = vmul.f32 -1.442695, %v1477_v41 }
0x131f   :  { %2797 = vpow2.f32 %v2277_v47 }
0x1327   :  { %v2796_v44 = vpop.eup %2795 }
0x1328   :  { %1490 = vrot.lane.b32.xlu0 %v2796_v44, %s2913_s26 }
0x1329   :  { %v2798_v48 = vpop.eup %2797 }
0x132a   :  { %v1481_v49 = vadd.f32 1.0, %v2798_v48 }
0x132c   :  { %2799 = vrcp.f32 %v1481_v49 }
0x1336   :  { %v2800_v28 = vpop.eup %2799 }
0x1337   :  { %v1488_v57 = vmul.f32 %v2800_v28, %v1486_v56 }
0x139a   :  { %v1491_v50 = vpop.permute.xlu0 %1490 }
0x139b   :  { %v1493_v52 = vmul.f32 %v2800_v28, %v1491_v50 }
0x139d   :  { %1495 = vrot.lane.b32.xlu1 %v1493_v52, %s2917_s8 }
0x140f   :  { %v1496_v58 = vpop.permute.xlu1 %1495 }
0x1410   :  { %v1498_v60 = vadd.f32 %v1496_v58, %v1488_v57 }
0x1412   :  { %2801 = vtanh.f32 %v1498_v60  ;;  %v1593_v14 = vrot.slane %v1498_v60, 6 }
0x141c   :  { %v2802_v61 = vpop.eup %2801 }
0x141d   :  { %1501 = vrot.lane.b32.xlu0 %v2802_v61, %s2913_s26 }
0x148f   :  { %v1502_v62 = vpop.permute.xlu0 %1501 }
0x1490   :  { %v1504_v63 = vmul.f32 %v2800_v28, %v1502_v62 }
0x1492   :  { %v1506_v1 = vrot.slane %v1504_v63, 2 }
0x1494   :  { %1507 = vrot.lane.b32.xlu1 %v1506_v1, %s2917_s8 }
0x1506   :  { %v1508_v2 = vpop.permute.xlu1 %1507 }
0x1507   :  { %2387 = vmatmul.mubr.msk.f32.vlgmr.msra.gmra.mrb[12].mxu0 %vm104_vm0, %v1508_v2 }
0x1508   :  { %2647 = vmatpush3.bf16.msra.mxu0 %v3152_v55  ;;  %2408 = vmatprep.mubr.msk.f32.mxu0 %vm2916_vm10, %v2912_v0 }
0x1509   :  { %2648 = vmatprep.subr.bf16.mxu0 %v2915_v38 }
0x150c   :  { %2650 = vmatpush3.bf16.msra.mxu0 %v3160_v3 }
0x150d   :  { %2657 = vmatprep.subr.bf16.mxu0 %v2915_v38 }
0x15da   :  { %v1577_v45 = vpop.f32.mrb[12].mxu0 }
0x15db   :  { %v1582_v40 = vrot.slane %v1577_v45, 4  ;;  %v2388_v4 = vpop.f32.mrb[13].mxu0 }
0x15dd   :  { %v1584_v5 = vadd.f32 %v1582_v40, %v3199_v51 }
0x15df   :  { %2803 = vtanh.f32 %v1584_v5  ;;  %v2279_v9 = vmul.f32 -1.442695, %v1584_v5 }
0x15e1   :  { %2805 = vpow2.f32 %v2279_v9 }
0x15e9   :  { %v2804_v7 = vpop.eup %2803 }
0x15ea   :  { %1597 = vrot.lane.b32.xlu0 %v2804_v7, %s2913_s26 }
0x15eb   :  { %v2806_v10 = vpop.eup %2805 }
0x15ec   :  { %v1588_v12 = vadd.f32 1.0, %v2806_v10 }
0x15ee   :  { %2807 = vrcp.f32 %v1588_v12 }
0x15f8   :  { %v2808_v13 = vpop.eup %2807 }
0x15f9   :  { %v1595_v21 = vmul.f32 %v2808_v13, %v1593_v14 }
0x165c   :  { %v1598_v8 = vpop.permute.xlu0 %1597 }
0x165d   :  { %v1600_v20 = vmul.f32 %v2808_v13, %v1598_v8 }
0x165f   :  { %1602 = vrot.lane.b32.xlu1 %v1600_v20, %s2917_s8 }
0x16d1   :  { %v1603_v15 = vpop.permute.xlu1 %1602 }
0x16d2   :  { %v1605_v27 = vadd.f32 %v1603_v15, %v1595_v21 }
0x16d4   :  { %2809 = vtanh.f32 %v1605_v27  ;;  %v1700_v16 = vrot.slane %v1605_v27, 6 }
0x16de   :  { %v2810_v31 = vpop.eup %2809 }
0x16df   :  { %1608 = vrot.lane.b32.xlu0 %v2810_v31, %s2913_s26 }
0x1751   :  { %v1609_v53 = vpop.permute.xlu0 %1608 }
0x1752   :  { %v1611_v35 = vmul.f32 %v2808_v13, %v1609_v53 }
0x1754   :  { %v1613_v18 = vrot.slane %v1611_v35, 4 }
0x1756   :  { %1614 = vrot.lane.b32.xlu1 %v1613_v18, %s2917_s8 }
0x17c8   :  { %v1615_v39 = vpop.permute.xlu1 %1614 }
0x17c9   :  { %2398 = vmatmul.mubr.msk.f32.vlgmr.msra.gmra.mrb[18].mxu1 %vm104_vm0, %v1615_v39 }
0x17ca   :  { %2653 = vmatpush3.bf16.msra.mxu1 %v3152_v55  ;;  %2419 = vmatprep.mubr.msk.f32.mxu1 %vm2916_vm10, %v2912_v0 }
0x17cb   :  { %2654 = vmatprep.subr.bf16.mxu1 %v2915_v38 }
0x17ce   :  { %2656 = vmatpush3.bf16.msra.mxu1 %v3160_v3 }
0x17cf   :  { %2663 = vmatprep.subr.bf16.mxu1 %v2915_v38 }
0x189c   :  { %v1684_v19 = vpop.f32.mrb[18].mxu1 }
0x189d   :  { %v1689_v23 = vrot.slane %v1684_v19, 2  ;;  %v2399_v43 = vpop.f32.mrb[19].mxu1 }
0x189f   :  { %v1691_v24 = vadd.f32 %v1689_v23, %v3199_v51 }
0x18a1   :  { %2811 = vtanh.f32 %v1691_v24  ;;  %v2281_v42 = vmul.f32 -1.442695, %v1691_v24 }
0x18a3   :  { %2813 = vpow2.f32 %v2281_v42 }
0x18ab   :  { %v2812_v25 = vpop.eup %2811 }
0x18ac   :  { %1704 = vrot.lane.b32.xlu0 %v2812_v25, %s2913_s26 }
0x18ad   :  { %v2814_v46 = vpop.eup %2813 }
0x18ae   :  { %v1695_v26 = vadd.f32 1.0, %v2814_v46 }
0x18b0   :  { %2815 = vrcp.f32 %v1695_v26 }
0x18ba   :  { %v2816_v29 = vpop.eup %2815 }
0x18bb   :  { %v1702_v33 = vmul.f32 %v2816_v29, %v1700_v16 }
0x191e   :  { %v1705_v30 = vpop.permute.xlu0 %1704 }
0x191f   :  { %v1707_v32 = vmul.f32 %v2816_v29, %v1705_v30 }
0x1921   :  { %1709 = vrot.lane.b32.xlu1 %v1707_v32, %s2917_s8 }
0x1993   :  { %v1710_v11 = vpop.permute.xlu1 %1709 }
0x1994   :  { %v1712_v54 = vadd.f32 %v1710_v11, %v1702_v33 }
0x1996   :  { %2817 = vtanh.f32 %v1712_v54  ;;  %v1804_v58 = vrot.slane %v1712_v54, 6 }
0x19a0   :  { %v2818_v51 = vpop.eup %2817 }
0x19a1   :  { %1715 = vrot.lane.b32.xlu0 %v2818_v51, %s2913_s26  ;;  %v2273_v51 = vmul.f32 -1.442695, %v3206_v22 }
0x1a13   :  { %v1716_v34 = vpop.permute.xlu0 %1715 }
0x1a14   :  { %v1718_v36 = vmul.f32 %v2816_v29, %v1716_v34 }
0x1a16   :  { %v1720_v59 = vrot.slane %v1718_v36, 6 }
0x1a18   :  { %1721 = vrot.lane.b32.xlu1 %v1720_v59, %s2917_s8 }
0x1a8a   :  { %v1722_v37 = vpop.permute.xlu1 %1721 }
0x1a8b   :  { %2409 = vmatmul.mubr.msk.f32.vlgmr.msra.gmra.mrb[14].mxu0 %vm104_vm0, %v1722_v37 }
0x1a8c   :  { %2659 = vmatpush3.bf16.msra.mxu0 %v3152_v55  ;;  %2430 = vmatprep.mubr.msk.f32.mxu0 %vm2916_vm10, %v2912_v0 }
0x1a8d   :  { %2660 = vmatprep.subr.bf16.mxu0 %v2915_v38 }
0x1a90   :  { %2662 = vmatpush3.bf16.msra.mxu0 %v3160_v3 }
0x1a91   :  { %2669 = vmatprep.subr.bf16.mxu0 %v2915_v38 }
0x1b5e   :  { %v1791_v41 = vpop.f32.mrb[14].mxu0 }
0x1b5f   :  { %v1795_v44 = vadd.f32 %v1791_v41, %v3204_v17  ;;  %v2410_v47 = vpop.f32.mrb[15].mxu0 }
0x1b61   :  { %2819 = vtanh.f32 %v1795_v44  ;;  %v2283_v49 = vmul.f32 -1.442695, %v1795_v44 }
0x1b63   :  { %2821 = vpow2.f32 %v2283_v49  ;;  %v1280_v49 = vrot.slane %v3178_v6, 2 }
0x1b6b   :  { %v2820_v48 = vpop.eup %2819 }
0x1b6c   :  { %1808 = vrot.lane.b32.xlu0 %v2820_v48, %s2913_s26 }
0x1b6d   :  { %v2822_v28 = vpop.eup %2821 }
0x1b6e   :  { %v1799_v50 = vadd.f32 1.0, %v2822_v28 }
0x1b70   :  { %2823 = vrcp.f32 %v1799_v50 }
0x1b7a   :  { %v2824_v52 = vpop.eup %2823 }
0x1b7b   :  { %v1806_v60 = vmul.f32 %v2824_v52, %v1804_v58 }
0x1bde   :  { %v1809_v56 = vpop.permute.xlu0 %1808 }
0x1bdf   :  { %v1811_v57 = vmul.f32 %v2824_v52, %v1809_v56 }
0x1be1   :  { %1813 = vrot.lane.b32.xlu1 %v1811_v57, %s2917_s8 }
0x1c53   :  { %v1814_v61 = vpop.permute.xlu1 %1813 }
0x1c54   :  { %v1816_v62 = vadd.f32 %v1814_v61, %v1806_v60 }
0x1c56   :  { %2825 = vtanh.f32 %v1816_v62 }
0x1c60   :  { %v2826_v63 = vpop.eup %2825 }
0x1c61   :  { %1819 = vrot.lane.b32.xlu0 %v2826_v63, %s2913_s26 }
0x1cd3   :  { %v1820_v1 = vpop.permute.xlu0 %1819 }
0x1cd4   :  { %v1822_v2 = vmul.f32 %v2824_v52, %v1820_v1 }
0x1cd6   :  { %1824 = vrot.lane.b32.xlu1 %v1822_v2, %s2917_s8 }
0x1d48   :  { %v1825_v45 = vpop.permute.xlu1 %1824 }
0x1d49   :  { %2420 = vmatmul.mubr.msk.f32.vlgmr.msra.gmra.mrb[20].mxu1 %vm104_vm0, %v1825_v45 }
0x1d4a   :  { %2665 = vmatpush3.bf16.msra.mxu1 %v3152_v55  ;;  %2441 = vmatprep.mubr.msk.f32.mxu1 %vm2916_vm10, %v2912_v0 }
0x1d4b   :  { %2666 = vmatprep.subr.bf16.mxu1 %v2915_v38 }
0x1d4e   :  { %2668 = vmatpush3.bf16.msra.mxu1 %v3160_v3  ;;  %v1910_v3 = vrot.slane %v1816_v62, 6 }
0x1e1c   :  { %v1894_v40 = vpop.f32.mrb[20].mxu1 }
0x1e1d   :  { %v1899_v4 = vrot.slane %v1894_v40, 6  ;;  %v2421_v5 = vpop.f32.mrb[21].mxu1 }
0x1e1f   :  { %v1901_v7 = vadd.f32 %v1899_v4, %v3204_v17 }
0x1e21   :  { %2827 = vtanh.f32 %v1901_v7  ;;  %v2285_v10 = vmul.f32 -1.442695, %v1901_v7 }
0x1e23   :  { %2829 = vpow2.f32 %v2285_v10  ;;  %v79_v10 = vld [vmem:[#allocation3 + $0x1b0] sm:$0xff] }
0x1e2b   :  { %v2828_v9 = vpop.eup %2827 }
0x1e2c   :  { %1914 = vrot.lane.b32.xlu0 %v2828_v9, %s2913_s26 }
0x1e2d   :  { %v2830_v12 = vpop.eup %2829 }
0x1e2e   :  { %v1905_v55 = vadd.f32 1.0, %v2830_v12 }
0x1e30   :  { %2831 = vrcp.f32 %v1905_v55 }
0x1e3a   :  { %v2832_v13 = vpop.eup %2831 }
0x1e3b   :  { %v1912_v14 = vmul.f32 %v2832_v13, %v1910_v3  ;;  %v81_v3 = vld [vmem:[#allocation3 + $0x1d0] sm:$0xff] }
0x1e9e   :  { %v1915_v8 = vpop.permute.xlu0 %1914 }
0x1e9f   :  { %v1917_v20 = vmul.f32 %v2832_v13, %v1915_v8 }
0x1ea1   :  { %1919 = vrot.lane.b32.xlu1 %v1917_v20, %s2917_s8  ;;  %v80_v20 = vld [vmem:[#allocation3 + $0x1c0] sm:$0xff] }
0x1f13   :  { %v1920_v21 = vpop.permute.xlu1 %1919 }
0x1f14   :  { %v1922_v15 = vadd.f32 %v1920_v21, %v1912_v14  ;;  %v2673_v14 = vpack.c.bf16 %v81_v3, %v80_v20  ;;  %v82_v21 = vld [vmem:[#allocation3 + $0x1e0] sm:$0xff] }
0x1f16   :  { %2833 = vtanh.f32 %v1922_v15 }
0x1f20   :  { %v2834_v27 = vpop.eup %2833 }
0x1f21   :  { %1925 = vrot.lane.b32.xlu0 %v2834_v27, %s2913_s26 }
0x1f93   :  { %v1926_v31 = vpop.permute.xlu0 %1925 }
0x1f94   :  { %v1928_v53 = vmul.f32 %v2832_v13, %v1926_v31  ;;  %v84_v31 = vld [vmem:[#allocation3 + $0x200] sm:$0xff] }
0x1f96   :  { %v1930_v35 = vrot.slane %v1928_v53, 2  ;;  %v85_v53 = vld [vmem:[#allocation3 + $0x210] sm:$0xff] }
0x1f98   :  { %1931 = vrot.lane.b32.xlu1 %v1930_v35, %s2917_s8  ;;  %v2679_v35 = vpack.c.bf16 %v85_v53, %v84_v31 }
0x200a   :  { %v1932_v18 = vpop.permute.xlu1 %1931 }
0x200b   :  { %2431 = vmatmul.mubr.msk.f32.vlgmr.msra.gmra.mrb[16].mxu0 %vm104_vm0, %v1932_v18 }
0x200c   :  { %2460 = vmatprep.mubr.msk.f32.mxu0 %vm2916_vm10, %v2912_v0  ;;  %v2017_v0 = vrot.slane %v1922_v15, 6  ;;  %v83_v15 = vld [vmem:[#allocation3 + $0x1f0] sm:$0xff] }
0x200d   :  { %v2676_v27 = vpack.c.bf16 %v83_v15, %v82_v21 }
0x20de   :  { %v2001_v39 = vpop.f32.mrb[16].mxu0 }
0x20df   :  { %v2006_v19 = vrot.slane %v2001_v39, 4  ;;  %v2432_v23 = vpop.f32.mrb[17].mxu0 }
0x20e1   :  { %v2008_v43 = vadd.f32 %v2006_v19, %v3204_v17 }
0x20e3   :  { %2835 = vtanh.f32 %v2008_v43  ;;  %v2287_v25 = vmul.f32 -1.442695, %v2008_v43 }
0x20e5   :  { %2837 = vpow2.f32 %v2287_v25 }
0x20ed   :  { %v2836_v24 = vpop.eup %2835 }
0x20ee   :  { %2021 = vrot.lane.b32.xlu0 %v2836_v24, %s2913_s26 }
0x20ef   :  { %v2838_v42 = vpop.eup %2837 }
0x20f0   :  { %v2012_v46 = vadd.f32 1.0, %v2838_v42  ;;  %v86_v42 = vld [vmem:[#allocation3 + $0x220] ss:$0 sm:$0xff] }
0x20f2   :  { %2839 = vrcp.f32 %v2012_v46 }
0x20fc   :  { %v2840_v26 = vpop.eup %2839 }
0x20fd   :  { %v2019_v32 = vmul.f32 %v2840_v26, %v2017_v0 }
0x2160   :  { %v2022_v29 = vpop.permute.xlu0 %2021 }
0x2161   :  { %v2024_v30 = vmul.f32 %v2840_v26, %v2022_v29 }
0x2163   :  { %2026 = vrot.lane.b32.xlu1 %v2024_v30, %s2917_s8 }
0x21d5   :  { %v2027_v16 = vpop.permute.xlu1 %2026 }
0x21d6   :  { %v2029_v33 = vadd.f32 %v2027_v16, %v2019_v32 }
0x21d8   :  { %2841 = vtanh.f32 %v2029_v33  ;;  %v2124_v4 = vrot.slane %v2029_v33, 6 }
0x21d9   :  { %2843 = vtanh.f32 %v3206_v22 }
0x21da   :  { %2845 = vpow2.f32 %v2273_v51 }
0x21e2   :  { %v2842_v11 = vpop.eup %2841 }
0x21e3   :  { %2032 = vrot.lane.b32.xlu0 %v2842_v11, %s2913_s26  ;;  %v2844_v54 = vpop.eup %2843 }
0x21e4   :  { %v2846_v34 = vpop.eup %2845 }
0x21e5   :  { %v1275_v36 = vadd.f32 1.0, %v2846_v34 }
0x21e7   :  { %1284 = vrot.lane.b32.xlu0 %v2844_v54, %s2913_s26  ;;  %2847 = vrcp.f32 %v1275_v36 }
0x21f1   :  { %v2848_v44 = vpop.eup %2847 }
0x21f2   :  { %v1282_v22 = vmul.f32 %v2848_v44, %v1280_v49 }
0x2255   :  { %v2033_v59 = vpop.permute.xlu0 %2032 }
0x2256   :  { %v2035_v37 = vmul.f32 %v2840_v26, %v2033_v59 }
0x2258   :  { %v2037_v41 = vrot.slane %v2035_v37, 4 }
0x2259   :  { %v1285_v47 = vpop.permute.xlu0 %1284 }
0x225a   :  { %v1287_v48 = vmul.f32 %v2848_v44, %v1285_v47  ;;  %2038 = vrot.lane.b32.xlu1 %v2037_v41, %s2917_s8 }
0x225c   :  { %1289 = vrot.lane.b32.xlu0 %v1287_v48, %s2917_s8 }
0x22cc   :  { %v2039_v28 = vpop.permute.xlu1 %2038 }
0x22cd   :  { %2442 = vmatmul.mubr.msk.f32.vlgmr.msra.gmra.mrb[22].mxu1 %vm104_vm0, %v2039_v28 }
0x22ce   :  { %v1290_v50 = vpop.permute.xlu0 %1289 }
0x22cf   :  { %v1292_v52 = vadd.f32 %v1290_v50, %v1282_v22 }
0x22d1   :  { %2849 = vtanh.f32 %v1292_v52 }
0x22db   :  { %v2850_v56 = vpop.eup %2849 }
0x22dc   :  { %1295 = vrot.lane.b32.xlu0 %v2850_v56, %s2913_s26 }
0x234e   :  { %v1296_v13 = vpop.permute.xlu0 %1295 }
0x234f   :  { %v1298_v8 = vmul.f32 %v2848_v44, %v1296_v13 }
0x23a0   :  { %v2108_v57 = vpop.f32.mrb[22].mxu1 }
0x23a1   :  { %v2113_v58 = vrot.slane %v2108_v57, 2  ;;  %v2443_v60 = vpop.f32.mrb[23].mxu1 }
0x23a3   :  { %v2115_v61 = vadd.f32 %v2113_v58, %v3204_v17  ;;  %v78_v17 = vld [vmem:[#allocation3 + $0x1a0] sm:$0xff] }
0x23a4   :  { %v2670_v12 = vpack.c.bf16 %v79_v10, %v78_v17 }
0x23a5   :  { %2851 = vtanh.f32 %v2115_v61  ;;  %v2289_v6 = vmul.f32 -1.442695, %v2115_v61 }
0x23a6   :  { %2671 = vmatpush3.bf16.msra.mxu0 %v2670_v12 }
0x23a7   :  { %2853 = vpow2.f32 %v2289_v6  ;;  %2672 = vmatprep.subr.bf16.mxu0 %v2915_v38 }
0x23aa   :  { %2674 = vmatpush3.bf16.msra.mxu0 %v2673_v14 }
0x23ab   :  { %2675 = vmatprep.subr.bf16.mxu0 %v2915_v38 }
0x23ae   :  { %2677 = vmatpush3.bf16.msra.mxu0 %v2676_v27 }
0x23af   :  { %v2852_v62 = vpop.eup %2851  ;;  %2678 = vmatprep.subr.bf16.mxu0 %v2915_v38 }
0x23b0   :  { %2128 = vrot.lane.b32.xlu1 %v2852_v62, %s2913_s26 }
0x23b1   :  { %v2854_v63 = vpop.eup %2853 }
0x23b2   :  { %v2119_v1 = vadd.f32 1.0, %v2854_v63  ;;  %2680 = vmatpush3.bf16.msra.mxu0 %v2679_v35 }
0x23b4   :  { %2855 = vrcp.f32 %v2119_v1 }
0x23be   :  { %v2856_v2 = vpop.eup %2855 }
0x23bf   :  { %v2126_v5 = vmul.f32 %v2856_v2, %v2124_v4 }
0x2422   :  { %v2129_v45 = vpop.permute.xlu1 %2128 }
0x2423   :  { %v2131_v40 = vmul.f32 %v2856_v2, %v2129_v45 }
0x2425   :  { %2133 = vrot.lane.b32.xlu1 %v2131_v40, %s2917_s8 }
0x2497   :  { %v2134_v7 = vpop.permute.xlu1 %2133 }
0x2498   :  { %v2136_v9 = vadd.f32 %v2134_v7, %v2126_v5 }
0x249a   :  { %2857 = vtanh.f32 %v2136_v9 }
0x24a4   :  { %v2858_v55 = vpop.eup %2857 }
0x24a5   :  { %2139 = vrot.lane.b32.xlu1 %v2858_v55, %s2913_s26 }
0x24a9   :  { %2148 = vrot.lane.b32.xlu1 %v1298_v8, %s2913_s26 }
0x2517   :  { %v2140_v18 = vpop.permute.xlu1 %2139 }
0x2518   :  { %v2142_v39 = vmul.f32 %v2856_v2, %v2140_v18 }
0x251a   :  { %2144 = vrot.lane.b32.xlu0 %v2142_v39, %s2917_s8 }
0x251b   :  { %v2149_v19 = vpop.permute.xlu1 %2148 }
0x258c   :  { %v2145_v23 = vpop.permute.xlu0 %2144 }
0x258d   :  { %v2151_v43 = vsel %vm104_vm0, %v2145_v23, %v2149_v19 }
0x258e   :  { %2859 = vtanh.f32 %v2151_v43 }
0x2598   :  { %v2860_v24 = vpop.eup %2859 }
0x2599   :  { %v2154_v25 = vrot.slane %v2860_v24, 6 }
0x259b   :  { %2461 = vmatmul.mubr.msk.f32.vlgmr.msra.gmra.mrb[18].mxu0 %vm188_vm1, %v2154_v25 }
0x266e   :  { %v2223_v38 = vpop.f32.mrb[18].mxu0 }
0x266f   :  { %v2224_v46 = vadd.f32 %v2223_v38, %v86_v42  ;;  %v2462_v26 = vpop.f32.mrb[19].mxu0 }
0x2671   :  { %2228 = vst.msk [vmem:[#allocation6] sm:$0x3] %vm2227_vm11, %v2224_v46 }
0x2672   :  { %2894 = shalt.err (!%p2891_p12)
}
0x2673   :  { %s2895_s13 = scalar_lea.hbm %s3311_s2, 32 }
0x2674   :  { %p2896_p13 = scmp.ne.s32.totalorder %s3311_s2, %s2895_s13  ;;  %p2899_p0 = scmp.lt.u32.totalorder %s2895_s13, %s3311_s2 }
0x2676   :  { %p2901_p1 = pnand %p2899_p0, %p2896_p13 }
0x2678   :  { %2904 = shalt.err (!%p2901_p1)
}
0x2679   :  { %2238 = dma.vmem_to_hbm [thread:$0]  %s2236_s9, 32, %s3311_s2, [#allocation5]  }
0x267a   :  { %2907 = dma.done.wait [#allocation5], 32  }
0x267b   :  { %2908 = vsyncadd [#allocation5], 4294967264 }
0x267c   :  { %2242 = vsyncpa [#allocation4], 1 }
0x267d   :  { %2243 = vsyncpa [#allocation5], 1 }

</bundles_post_ra>
